<compile_context>
chip_gen: v6e
topology: v6e:2x2x1
jax: 0.10.0
libtpu: 0.0.40
codegen_flags: <defaults>
</compile_context>

<pallas_src>
import functools

import jax
import jax.numpy as jnp
from jax.experimental import pallas as pl
from jax.experimental.pallas import tpu as pltpu


def _full_spec(shape):
    """Whole-array block for a grid=(1,) pallas_call."""
    nd = len(shape)
    return pl.BlockSpec(shape, lambda i, _nd=nd: (0,) * _nd)


def make_lstm_classifier_kernel(num_layers: int, hidden_size: int,
                                seq_len: int, batch_pad: int):
    H = hidden_size
    T = seq_len
    Bp = batch_pad

    def kernel(*refs):
        # refs = (x_ref,                       (T*Bp, In)  bf16
        #         w_ih0, w_hh0, b0,            (In,4H),(H,4H) bf16, (1,4H) f32
        #         [w_cat_l, b_l] * (L-1),      (2H,4H) bf16, (1,4H) f32
        #         w_fc, b_fc,                  (H,Cp) bf16, (1,Cp) f32
        #         out_ref,                     (Bp, Cp) f32
        #         g0_scr)                      (T*Bp, 4H) f32
        x_ref = refs[0]
        w_ih0_ref, w_hh0_ref, b0_ref = refs[1], refs[2], refs[3]
        idx = 4
        w_cat_refs, b_refs = [], []
        for _ in range(1, num_layers):
            w_cat_refs.append(refs[idx])
            b_refs.append(refs[idx + 1])
            idx += 2
        w_fc_ref = refs[idx]
        b_fc_ref = refs[idx + 1]
        out_ref = refs[idx + 2]
        g0_scr = refs[idx + 3]

        # ---- Phase 1: batched layer-0 input projection over ALL time steps.
        # One large bf16 MXU matmul (f32 accumulate); folded layer-0 bias
        # (b_ih + b_hh) added once here in f32.
        g0_scr[...] = (
            jnp.dot(x_ref[...], w_ih0_ref[...],
                    preferred_element_type=jnp.float32)
            + b0_ref[...]
        )

        # ---- Hoist loop invariants out of the time loop.
        # (Fine at H=32 — each fits in a few vregs.  At H>=256 read the refs
        # at the dot call site instead to avoid regalloc pressure/spills.)
        w_hh0 = w_hh0_ref[...]                       # (H, 4H)   bf16
        w_cat = [r[...] for r in w_cat_refs]         # (2H, 4H)  bf16
        # Hoisted bias broadcasts: avoids T*(L-1) broadcast_in_dim emissions
        # inside the (partially) unrolled loop body.
        bias_full = [jnp.broadcast_to(r[...], (Bp, 4 * H)) for r in b_refs]

        # ---- Phase 2: serial recurrence over T (h/c carried in registers,
        # kept in f32; bf16 only at the MXU operand boundary).
        def step(t, carry):
            hs, cs = carry
            hs, cs = list(hs), list(cs)
            row = pl.multiple_of(t * Bp, 8)
            layer_in = None
            for l in range(num_layers):
                if l == 0:
                    gates = g0_scr[pl.ds(row, Bp), :] + jnp.dot(
                        hs[0].astype(jnp.bfloat16), w_hh0,
                        preferred_element_type=jnp.float32)
                else:
                    # Single fused matmul: [layer_in, h] @ [W_ih; W_hh].
                    cat = jnp.concatenate([layer_in, hs[l]],
                                          axis=1).astype(jnp.bfloat16)
                    gates = jnp.dot(cat, w_cat[l - 1],
                                    preferred_element_type=jnp.float32) \
                        + bias_full[l - 1]
                # Packed gate order [i, f, o, g]: one contiguous sigmoid over
                # the first 3H lanes, one tanh over the last H lanes.
                sg = jax.nn.sigmoid(gates[:, :3 * H])
                i_g = sg[:, 0:H]
                f_g = sg[:, H:2 * H]
                o_g = sg[:, 2 * H:3 * H]
                g_g = jnp.tanh(gates[:, 3 * H:])
                c_new = f_g * cs[l] + i_g * g_g
                h_new = o_g * jnp.tanh(c_new)
                hs[l] = h_new
                cs[l] = c_new
                layer_in = h_new
            return tuple(hs), tuple(cs)

        zeros = tuple(jnp.zeros((Bp, H), jnp.float32)
                      for _ in range(num_layers))
        hs, _ = jax.lax.fori_loop(0, T, step, (zeros, zeros),
                                  unroll=min(T, 8))

        # ---- Final linear on the last step's top-layer hidden state.
        # Output padded to a lane-dense 128-wide block (sliced in wrapper).
        out_ref[...] = (
            jnp.dot(hs[num_layers - 1].astype(jnp.bfloat16), w_fc_ref[...],
                    preferred_element_type=jnp.float32)
            + b_fc_ref[...]
        )

    return kernel


def lstm_classifier_forward(x, params, *, num_layers, hidden_size, num_classes):
    """x: (B, T, input_size) float32, batch-first like PyTorch."""
    B, T, In = x.shape
    H = hidden_size
    B_pad = max(8, ((B + 7) // 8) * 8)          # f32 sublane width
    C_pad = params["w_fc"].shape[1]             # padded to >=128 lanes

    # Time-major, batch-pad, flatten to (T*Bp, In) rows, cast to bf16 for the
    # batched layer-0 MXU matmul.  Under jit these fuse into one HBM pass
    # feeding the pallas_call.
    x_tm = jnp.transpose(x, (1, 0, 2))                         # (T, B, In)
    x_pad = jnp.pad(x_tm, ((0, 0), (0, B_pad - B), (0, 0)))    # (T, Bp, In)
    x_rows = x_pad.reshape(T * B_pad, In).astype(jnp.bfloat16)

    inputs = [x_rows]
    in_specs = [_full_spec(x_rows.shape)]

    # Layer 0: separate W_ih / W_hh (W_ih is used in the batched Phase-1 dot).
    w_ih0, w_hh0, b0 = params["layers"][0]
    for arr in (w_ih0.astype(jnp.bfloat16), w_hh0.astype(jnp.bfloat16), b0):
        inputs.append(arr)
        in_specs.append(_full_spec(arr.shape))
    # Layers >= 1: fused (2H, 4H) weight + f32 bias.
    for l in range(1, num_layers):
        w_cat, b = params["layers"][l]
        w_cat = w_cat.astype(jnp.bfloat16)
        inputs += [w_cat, b]
        in_specs += [_full_spec(w_cat.shape), _full_spec(b.shape)]
    w_fc = params["w_fc"].astype(jnp.bfloat16)
    inputs += [w_fc, params["b_fc"]]
    in_specs += [_full_spec(w_fc.shape), _full_spec(params["b_fc"].shape)]

    out = pl.pallas_call(
        make_lstm_classifier_kernel(num_layers, H, T, B_pad),
        out_shape=jax.ShapeDtypeStruct((B_pad, C_pad), jnp.float32),
        grid=(1,),
        in_specs=in_specs,
        out_specs=pl.BlockSpec((B_pad, C_pad), lambda i: (0, 0)),
        scratch_shapes=[
            pltpu.VMEM((T * B_pad, 4 * H), jnp.float32),  # precomputed x@W_ih0
        ],
        compiler_params=pltpu.CompilerParams(
            dimension_semantics=("arbitrary",),
            # Fits every generation at this shape; raise toward ~100 MiB on
            # v5e/v6e for large T/H, or T-chunk the grid on v7x (64 MiB VMEM).
            vmem_limit_bytes=32 * 1024 * 1024,
        ),
    )(*inputs)
    return out[:B, :num_classes]


def _reorder_ifgo_to_ifog(w):
    """Reorder the packed 4H leading axis from PyTorch [i,f,g,o] to [i,f,o,g]."""
    i, f, g, o = jnp.split(w, 4, axis=0)
    return jnp.concatenate([i, f, o, g], axis=0)


def init_params(key, input_size, hidden_size, num_layers, num_classes):
    """Deterministic init mirroring nn.LSTM / nn.Linear parameter shapes.

    PyTorch stores weight_ih_l{k}: (4H, in_dim) in gate order [i,f,g,o] with
    U(-1/sqrt(H), 1/sqrt(H)) init.  We reorder to [i,f,o,g] (so sigmoid/tanh
    are contiguous), pre-transpose, fold b_ih + b_hh, and for layers >= 1
    concatenate W_ih/W_hh into one (2H, 4H) weight (math identical to the
    PyTorch cell).  Params stay f32; the kernel wrapper casts weights to bf16.
    """
    H = hidden_size
    k = 1.0 / jnp.sqrt(H)
    layers = []
    for l in range(num_layers):
        in_dim = input_size if l == 0 else H
        key, k1, k2, k3, k4 = jax.random.split(key, 5)
        w_ih = jax.random.uniform(k1, (4 * H, in_dim), jnp.float32, -k, k)
        w_hh = jax.random.uniform(k2, (4 * H, H), jnp.float32, -k, k)
        b_ih = jax.random.uniform(k3, (4 * H,), jnp.float32, -k, k)
        b_hh = jax.random.uniform(k4, (4 * H,), jnp.float32, -k, k)
        w_ih_t = _reorder_ifgo_to_ifog(w_ih).T                 # (in_dim, 4H)
        w_hh_t = _reorder_ifgo_to_ifog(w_hh).T                 # (H, 4H)
        b = _reorder_ifgo_to_ifog(b_ih + b_hh)[None, :]        # (1, 4H)
        if l == 0:
            layers.append((w_ih_t, w_hh_t, b))
        else:
            # Fused [x; h] -> gates weight: one MXU matmul per layer per step.
            layers.append((jnp.concatenate([w_ih_t, w_hh_t], axis=0), b))
    key, k5, k6 = jax.random.split(key, 3)
    w_fc = jax.random.uniform(k5, (num_classes, H), jnp.float32, -k, k)
    b_fc = jax.random.uniform(k6, (num_classes,), jnp.float32, -k, k)
    # Pad the classifier to a lane-dense 128-wide output.
    C_pad = max(128, ((num_classes + 127) // 128) * 128)
    params = {
        "layers": layers,
        "w_fc": jnp.zeros((H, C_pad), jnp.float32).at[:, :num_classes].set(w_fc.T),
        "b_fc": jnp.zeros((1, C_pad), jnp.float32).at[0, :num_classes].set(b_fc),
    }
    return params


def reference_forward(x, params, *, num_layers, hidden_size, num_classes):
    """Pure-JAX f32 reference (same math as the PyTorch LSTM cell, using the
    reordered/fused packing).  TODO(synk): true torch.nn.LSTM parity would
    need torch + the original checkpoint, which cannot be loaded in-script."""
    B, T, _ = x.shape
    H = hidden_size
    h = [jnp.zeros((B, H), jnp.float32) for _ in range(num_layers)]
    c = [jnp.zeros((B, H), jnp.float32) for _ in range(num_layers)]
    for t in range(T):
        layer_in = x[:, t, :]
        for l in range(num_layers):
            if l == 0:
                w_ih, w_hh, b = params["layers"][0]
                gates = layer_in @ w_ih + h[0] @ w_hh + b
            else:
                w_cat, b = params["layers"][l]
                gates = jnp.concatenate([layer_in, h[l]], axis=1) @ w_cat + b
            i_g = jax.nn.sigmoid(gates[:, 0:H])
            f_g = jax.nn.sigmoid(gates[:, H:2 * H])
            o_g = jax.nn.sigmoid(gates[:, 2 * H:3 * H])
            g_g = jnp.tanh(gates[:, 3 * H:4 * H])
            c[l] = f_g * c[l] + i_g * g_g
            h[l] = o_g * jnp.tanh(c[l])
            layer_in = h[l]
    logits = h[num_layers - 1] @ params["w_fc"] + params["b_fc"]
    return logits[:, :num_classes]


if __name__ == "__main__":
    # Small shapes consistent with the module's forward (checkpoint
    # hyperparameters/weights are synthesized in-script instead of torch.load).
    batch = 2
    seq_len = 8
    input_size = 16
    hidden_size = 32
    num_layers = 2
    num_classes = 3

    key = jax.random.PRNGKey(0)
    key, xk, pk = jax.random.split(key, 3)
    x = jax.random.normal(xk, (batch, seq_len, input_size), jnp.float32)
    params = init_params(pk, input_size, hidden_size, num_layers, num_classes)

    fwd = jax.jit(functools.partial(
        lstm_classifier_forward,
        num_layers=num_layers, hidden_size=hidden_size,
        num_classes=num_classes))
    out = jax.block_until_ready(fwd(x, params))

    ref = reference_forward(
        x, params,
        num_layers=num_layers, hidden_size=hidden_size, num_classes=num_classes,
    )
    assert out.shape == (batch, num_classes)
    # Tolerance relaxed vs. the pure-f32 reference because MXU operands are
    # bf16 (f32 accumulation); observed error is O(1e-2) at these shapes.
    assert jnp.allclose(out, ref, atol=5e-2, rtol=5e-2), (out, ref)

    print("KERNEL_OK")
</pallas_src>

<mosaic_0001>
module attributes {stable_mosaic.version = 11 : i64} {
  func.func @kernel(%arg0: i32, %arg1: memref<64x16xbf16, #tpu.memory_space<vmem>>, %arg2: memref<16x128xbf16, #tpu.memory_space<vmem>>, %arg3: memref<32x128xbf16, #tpu.memory_space<vmem>>, %arg4: memref<1x128xf32, #tpu.memory_space<vmem>>, %arg5: memref<64x128xbf16, #tpu.memory_space<vmem>>, %arg6: memref<1x128xf32, #tpu.memory_space<vmem>>, %arg7: memref<32x128xbf16, #tpu.memory_space<vmem>>, %arg8: memref<1x128xf32, #tpu.memory_space<vmem>>, %arg9: memref<8x128xf32, #tpu.memory_space<vmem>>, %arg10: memref<64x128xf32, #tpu.memory_space<vmem>>) attributes {dimension_semantics = [#tpu.dimension_semantics<arbitrary>], iteration_bounds = array<i64: 1>, scalar_prefetch = 0 : i64, scratch_operands = 1 : i64, tpu.core_type = #tpu.core_type<tc>, window_params = [{pipeline_mode = #tpu.pipeline_mode<synchronous>, transform_indices = @transform_0, window_bounds = array<i64: 64, 16>}, {pipeline_mode = #tpu.pipeline_mode<synchronous>, transform_indices = @transform_1, window_bounds = array<i64: 16, 128>}, {pipeline_mode = #tpu.pipeline_mode<synchronous>, transform_indices = @transform_2, window_bounds = array<i64: 32, 128>}, {pipeline_mode = #tpu.pipeline_mode<synchronous>, transform_indices = @transform_3, window_bounds = array<i64: 1, 128>}, {pipeline_mode = #tpu.pipeline_mode<synchronous>, transform_indices = @transform_4, window_bounds = array<i64: 64, 128>}, {pipeline_mode = #tpu.pipeline_mode<synchronous>, transform_indices = @transform_5, window_bounds = array<i64: 1, 128>}, {pipeline_mode = #tpu.pipeline_mode<synchronous>, transform_indices = @transform_6, window_bounds = array<i64: 32, 128>}, {pipeline_mode = #tpu.pipeline_mode<synchronous>, transform_indices = @transform_7, window_bounds = array<i64: 1, 128>}, {pipeline_mode = #tpu.pipeline_mode<synchronous>, transform_indices = @transform_8, window_bounds = array<i64: 8, 128>}]} {
    %c0 = arith.constant 0 : index
    %c0_0 = arith.constant 0 : index
    %0 = vector.load %arg1[%c0, %c0_0] : memref<64x16xbf16, #tpu.memory_space<vmem>>, vector<64x16xbf16>
    %c0_1 = arith.constant 0 : index
    %c0_2 = arith.constant 0 : index
    %1 = vector.load %arg2[%c0_1, %c0_2] : memref<16x128xbf16, #tpu.memory_space<vmem>>, vector<16x128xbf16>
    %cst = arith.constant dense<0.000000e+00> : vector<64x128xf32>
    %2 = tpu.matmul %0, %1, %cst {dimension_numbers = #tpu.dot_dimension_numbers<[1], [0], [0], [1], [0, 0, 1, 1], [], []>} : vector<64x16xbf16>, vector<16x128xbf16>, vector<64x128xf32> -> vector<64x128xf32>
    %c0_3 = arith.constant 0 : index
    %c0_4 = arith.constant 0 : index
    %3 = vector.load %arg4[%c0_3, %c0_4] : memref<1x128xf32, #tpu.memory_space<vmem>>, vector<1x128xf32>
    %4 = vector.broadcast %3 : vector<1x128xf32> to vector<64x128xf32>
    %5 = arith.addf %2, %4 : vector<64x128xf32>
    %c0_5 = arith.constant 0 : index
    %c0_6 = arith.constant 0 : index
    %6 = vector.load %arg10[%c0_5, %c0_6] : memref<64x128xf32, #tpu.memory_space<vmem>>, vector<64x128xf32>
    tpu.vector_store %arg10[%c0_5, %c0_6], %5 {strides = array<i32>} : memref<64x128xf32, #tpu.memory_space<vmem>>, vector<64x128xf32>,
    %c0_7 = arith.constant 0 : index
    %c0_8 = arith.constant 0 : index
    %7 = vector.load %arg3[%c0_7, %c0_8] : memref<32x128xbf16, #tpu.memory_space<vmem>>, vector<32x128xbf16>
    %c0_9 = arith.constant 0 : index
    %c0_10 = arith.constant 0 : index
    %8 = vector.load %arg5[%c0_9, %c0_10] : memref<64x128xbf16, #tpu.memory_space<vmem>>, vector<64x128xbf16>
    %c0_11 = arith.constant 0 : index
    %c0_12 = arith.constant 0 : index
    %9 = vector.load %arg6[%c0_11, %c0_12] : memref<1x128xf32, #tpu.memory_space<vmem>>, vector<1x128xf32>
    %10 = vector.shape_cast %9 : vector<1x128xf32> to vector<1x128xf32>
    %11 = vector.broadcast %10 : vector<1x128xf32> to vector<8x128xf32>
    %cst_13 = arith.constant 0.000000e+00 : f32
    %12 = vector.broadcast %cst_13 : f32 to vector<8x32xf32>
    %cst_14 = arith.constant 0.000000e+00 : f32
    %13 = vector.broadcast %cst_14 : f32 to vector<8x32xf32>
    %c0_i32 = arith.constant 0 : i32
    %c8_i32 = arith.constant 8 : i32
    %14 = arith.muli %c0_i32, %c8_i32 : i32
    %15 = tpu.assume_multiple %14, 8 : i32
    %16 = arith.index_cast %15 : i32 to index
    %c0_15 = arith.constant 0 : index
    %17 = vector.load %arg10[%16, %c0_15] : memref<64x128xf32, #tpu.memory_space<vmem>>, vector<8x128xf32>
    %18 = arith.truncf %12 : vector<8x32xf32> to vector<8x32xbf16>
    %cst_16 = arith.constant dense<0.000000e+00> : vector<8x128xf32>
    %19 = tpu.matmul %18, %7, %cst_16 {dimension_numbers = #tpu.dot_dimension_numbers<[1], [0], [0], [1], [0, 0, 1, 1], [], []>} : vector<8x32xbf16>, vector<32x128xbf16>, vector<8x128xf32> -> vector<8x128xf32>
    %20 = arith.addf %17, %19 : vector<8x128xf32>
    %21 = vector.extract_strided_slice %20 {offsets = [0, 0], sizes = [8, 96], strides = [1, 1]} : vector<8x128xf32> to vector<8x96xf32>
    %22 = arith.negf %21 : vector<8x96xf32>
    %23 = math.exp %22 : vector<8x96xf32>
    %cst_17 = arith.constant 1.000000e+00 : f32
    %24 = vector.broadcast %cst_17 : f32 to vector<8x96xf32>
    %25 = arith.addf %24, %23 : vector<8x96xf32>
    %26 = arith.divf %24, %25 : vector<8x96xf32>
    %27 = vector.extract_strided_slice %26 {offsets = [0, 0], sizes = [8, 32], strides = [1, 1]} : vector<8x96xf32> to vector<8x32xf32>
    %28 = vector.extract_strided_slice %26 {offsets = [0, 32], sizes = [8, 32], strides = [1, 1]} : vector<8x96xf32> to vector<8x32xf32>
    %29 = vector.extract_strided_slice %26 {offsets = [0, 64], sizes = [8, 32], strides = [1, 1]} : vector<8x96xf32> to vector<8x32xf32>
    %30 = vector.extract_strided_slice %20 {offsets = [0, 96], sizes = [8, 32], strides = [1, 1]} : vector<8x128xf32> to vector<8x32xf32>
    %31 = math.tanh %30 : vector<8x32xf32>
    %32 = arith.mulf %28, %12 : vector<8x32xf32>
    %33 = arith.mulf %27, %31 : vector<8x32xf32>
    %34 = arith.addf %32, %33 : vector<8x32xf32>
    %35 = math.tanh %34 : vector<8x32xf32>
    %36 = arith.mulf %29, %35 : vector<8x32xf32>
    %37 = tpu.concatenate %36, %13 in 1 : vector<8x32xf32>, vector<8x32xf32> -> vector<8x64xf32>
    %38 = arith.truncf %37 : vector<8x64xf32> to vector<8x64xbf16>
    %cst_18 = arith.constant dense<0.000000e+00> : vector<8x128xf32>
    %39 = tpu.matmul %38, %8, %cst_18 {dimension_numbers = #tpu.dot_dimension_numbers<[1], [0], [0], [1], [0, 0, 1, 1], [], []>} : vector<8x64xbf16>, vector<64x128xbf16>, vector<8x128xf32> -> vector<8x128xf32>
    %40 = arith.addf %39, %11 : vector<8x128xf32>
    %41 = vector.extract_strided_slice %40 {offsets = [0, 0], sizes = [8, 96], strides = [1, 1]} : vector<8x128xf32> to vector<8x96xf32>
    %42 = arith.negf %41 : vector<8x96xf32>
    %43 = math.exp %42 : vector<8x96xf32>
    %cst_19 = arith.constant 1.000000e+00 : f32
    %44 = vector.broadcast %cst_19 : f32 to vector<8x96xf32>
    %45 = arith.addf %44, %43 : vector<8x96xf32>
    %46 = arith.divf %44, %45 : vector<8x96xf32>
    %47 = vector.extract_strided_slice %46 {offsets = [0, 0], sizes = [8, 32], strides = [1, 1]} : vector<8x96xf32> to vector<8x32xf32>
    %48 = vector.extract_strided_slice %46 {offsets = [0, 32], sizes = [8, 32], strides = [1, 1]} : vector<8x96xf32> to vector<8x32xf32>
    %49 = vector.extract_strided_slice %46 {offsets = [0, 64], sizes = [8, 32], strides = [1, 1]} : vector<8x96xf32> to vector<8x32xf32>
    %50 = vector.extract_strided_slice %40 {offsets = [0, 96], sizes = [8, 32], strides = [1, 1]} : vector<8x128xf32> to vector<8x32xf32>
    %51 = math.tanh %50 : vector<8x32xf32>
    %52 = arith.mulf %48, %13 : vector<8x32xf32>
    %53 = arith.mulf %47, %51 : vector<8x32xf32>
    %54 = arith.addf %52, %53 : vector<8x32xf32>
    %55 = math.tanh %54 : vector<8x32xf32>
    %56 = arith.mulf %49, %55 : vector<8x32xf32>
    %c1_i32 = arith.constant 1 : i32
    %c8_i32_20 = arith.constant 8 : i32
    %57 = arith.muli %c1_i32, %c8_i32_20 : i32
    %58 = tpu.assume_multiple %57, 8 : i32
    %59 = arith.index_cast %58 : i32 to index
    %c0_21 = arith.constant 0 : index
    %60 = vector.load %arg10[%59, %c0_21] : memref<64x128xf32, #tpu.memory_space<vmem>>, vector<8x128xf32>
    %61 = arith.truncf %36 : vector<8x32xf32> to vector<8x32xbf16>
    %cst_22 = arith.constant dense<0.000000e+00> : vector<8x128xf32>
    %62 = tpu.matmul %61, %7, %cst_22 {dimension_numbers = #tpu.dot_dimension_numbers<[1], [0], [0], [1], [0, 0, 1, 1], [], []>} : vector<8x32xbf16>, vector<32x128xbf16>, vector<8x128xf32> -> vector<8x128xf32>
    %63 = arith.addf %60, %62 : vector<8x128xf32>
    %64 = vector.extract_strided_slice %63 {offsets = [0, 0], sizes = [8, 96], strides = [1, 1]} : vector<8x128xf32> to vector<8x96xf32>
    %65 = arith.negf %64 : vector<8x96xf32>
    %66 = math.exp %65 : vector<8x96xf32>
    %cst_23 = arith.constant 1.000000e+00 : f32
    %67 = vector.broadcast %cst_23 : f32 to vector<8x96xf32>
    %68 = arith.addf %67, %66 : vector<8x96xf32>
    %69 = arith.divf %67, %68 : vector<8x96xf32>
    %70 = vector.extract_strided_slice %69 {offsets = [0, 0], sizes = [8, 32], strides = [1, 1]} : vector<8x96xf32> to vector<8x32xf32>
    %71 = vector.extract_strided_slice %69 {offsets = [0, 32], sizes = [8, 32], strides = [1, 1]} : vector<8x96xf32> to vector<8x32xf32>
    %72 = vector.extract_strided_slice %69 {offsets = [0, 64], sizes = [8, 32], strides = [1, 1]} : vector<8x96xf32> to vector<8x32xf32>
    %73 = vector.extract_strided_slice %63 {offsets = [0, 96], sizes = [8, 32], strides = [1, 1]} : vector<8x128xf32> to vector<8x32xf32>
    %74 = math.tanh %73 : vector<8x32xf32>
    %75 = arith.mulf %71, %34 : vector<8x32xf32>
    %76 = arith.mulf %70, %74 : vector<8x32xf32>
    %77 = arith.addf %75, %76 : vector<8x32xf32>
    %78 = math.tanh %77 : vector<8x32xf32>
    %79 = arith.mulf %72, %78 : vector<8x32xf32>
    %80 = tpu.concatenate %79, %56 in 1 : vector<8x32xf32>, vector<8x32xf32> -> vector<8x64xf32>
    %81 = arith.truncf %80 : vector<8x64xf32> to vector<8x64xbf16>
    %cst_24 = arith.constant dense<0.000000e+00> : vector<8x128xf32>
    %82 = tpu.matmul %81, %8, %cst_24 {dimension_numbers = #tpu.dot_dimension_numbers<[1], [0], [0], [1], [0, 0, 1, 1], [], []>} : vector<8x64xbf16>, vector<64x128xbf16>, vector<8x128xf32> -> vector<8x128xf32>
    %83 = arith.addf %82, %11 : vector<8x128xf32>
    %84 = vector.extract_strided_slice %83 {offsets = [0, 0], sizes = [8, 96], strides = [1, 1]} : vector<8x128xf32> to vector<8x96xf32>
    %85 = arith.negf %84 : vector<8x96xf32>
    %86 = math.exp %85 : vector<8x96xf32>
    %cst_25 = arith.constant 1.000000e+00 : f32
    %87 = vector.broadcast %cst_25 : f32 to vector<8x96xf32>
    %88 = arith.addf %87, %86 : vector<8x96xf32>
    %89 = arith.divf %87, %88 : vector<8x96xf32>
    %90 = vector.extract_strided_slice %89 {offsets = [0, 0], sizes = [8, 32], strides = [1, 1]} : vector<8x96xf32> to vector<8x32xf32>
    %91 = vector.extract_strided_slice %89 {offsets = [0, 32], sizes = [8, 32], strides = [1, 1]} : vector<8x96xf32> to vector<8x32xf32>
    %92 = vector.extract_strided_slice %89 {offsets = [0, 64], sizes = [8, 32], strides = [1, 1]} : vector<8x96xf32> to vector<8x32xf32>
    %93 = vector.extract_strided_slice %83 {offsets = [0, 96], sizes = [8, 32], strides = [1, 1]} : vector<8x128xf32> to vector<8x32xf32>
    %94 = math.tanh %93 : vector<8x32xf32>
    %95 = arith.mulf %91, %54 : vector<8x32xf32>
    %96 = arith.mulf %90, %94 : vector<8x32xf32>
    %97 = arith.addf %95, %96 : vector<8x32xf32>
    %98 = math.tanh %97 : vector<8x32xf32>
    %99 = arith.mulf %92, %98 : vector<8x32xf32>
    %c2_i32 = arith.constant 2 : i32
    %c8_i32_26 = arith.constant 8 : i32
    %100 = arith.muli %c2_i32, %c8_i32_26 : i32
    %101 = tpu.assume_multiple %100, 8 : i32
    %102 = arith.index_cast %101 : i32 to index
    %c0_27 = arith.constant 0 : index
    %103 = vector.load %arg10[%102, %c0_27] : memref<64x128xf32, #tpu.memory_space<vmem>>, vector<8x128xf32>
    %104 = arith.truncf %79 : vector<8x32xf32> to vector<8x32xbf16>
    %cst_28 = arith.constant dense<0.000000e+00> : vector<8x128xf32>
    %105 = tpu.matmul %104, %7, %cst_28 {dimension_numbers = #tpu.dot_dimension_numbers<[1], [0], [0], [1], [0, 0, 1, 1], [], []>} : vector<8x32xbf16>, vector<32x128xbf16>, vector<8x128xf32> -> vector<8x128xf32>
    %106 = arith.addf %103, %105 : vector<8x128xf32>
    %107 = vector.extract_strided_slice %106 {offsets = [0, 0], sizes = [8, 96], strides = [1, 1]} : vector<8x128xf32> to vector<8x96xf32>
    %108 = arith.negf %107 : vector<8x96xf32>
    %109 = math.exp %108 : vector<8x96xf32>
    %cst_29 = arith.constant 1.000000e+00 : f32
    %110 = vector.broadcast %cst_29 : f32 to vector<8x96xf32>
    %111 = arith.addf %110, %109 : vector<8x96xf32>
    %112 = arith.divf %110, %111 : vector<8x96xf32>
    %113 = vector.extract_strided_slice %112 {offsets = [0, 0], sizes = [8, 32], strides = [1, 1]} : vector<8x96xf32> to vector<8x32xf32>
    %114 = vector.extract_strided_slice %112 {offsets = [0, 32], sizes = [8, 32], strides = [1, 1]} : vector<8x96xf32> to vector<8x32xf32>
    %115 = vector.extract_strided_slice %112 {offsets = [0, 64], sizes = [8, 32], strides = [1, 1]} : vector<8x96xf32> to vector<8x32xf32>
    %116 = vector.extract_strided_slice %106 {offsets = [0, 96], sizes = [8, 32], strides = [1, 1]} : vector<8x128xf32> to vector<8x32xf32>
    %117 = math.tanh %116 : vector<8x32xf32>
    %118 = arith.mulf %114, %77 : vector<8x32xf32>
    %119 = arith.mulf %113, %117 : vector<8x32xf32>
    %120 = arith.addf %118, %119 : vector<8x32xf32>
    %121 = math.tanh %120 : vector<8x32xf32>
    %122 = arith.mulf %115, %121 : vector<8x32xf32>
    %123 = tpu.concatenate %122, %99 in 1 : vector<8x32xf32>, vector<8x32xf32> -> vector<8x64xf32>
    %124 = arith.truncf %123 : vector<8x64xf32> to vector<8x64xbf16>
    %cst_30 = arith.constant dense<0.000000e+00> : vector<8x128xf32>
    %125 = tpu.matmul %124, %8, %cst_30 {dimension_numbers = #tpu.dot_dimension_numbers<[1], [0], [0], [1], [0, 0, 1, 1], [], []>} : vector<8x64xbf16>, vector<64x128xbf16>, vector<8x128xf32> -> vector<8x128xf32>
    %126 = arith.addf %125, %11 : vector<8x128xf32>
    %127 = vector.extract_strided_slice %126 {offsets = [0, 0], sizes = [8, 96], strides = [1, 1]} : vector<8x128xf32> to vector<8x96xf32>
    %128 = arith.negf %127 : vector<8x96xf32>
    %129 = math.exp %128 : vector<8x96xf32>
    %cst_31 = arith.constant 1.000000e+00 : f32
    %130 = vector.broadcast %cst_31 : f32 to vector<8x96xf32>
    %131 = arith.addf %130, %129 : vector<8x96xf32>
    %132 = arith.divf %130, %131 : vector<8x96xf32>
    %133 = vector.extract_strided_slice %132 {offsets = [0, 0], sizes = [8, 32], strides = [1, 1]} : vector<8x96xf32> to vector<8x32xf32>
    %134 = vector.extract_strided_slice %132 {offsets = [0, 32], sizes = [8, 32], strides = [1, 1]} : vector<8x96xf32> to vector<8x32xf32>
    %135 = vector.extract_strided_slice %132 {offsets = [0, 64], sizes = [8, 32], strides = [1, 1]} : vector<8x96xf32> to vector<8x32xf32>
    %136 = vector.extract_strided_slice %126 {offsets = [0, 96], sizes = [8, 32], strides = [1, 1]} : vector<8x128xf32> to vector<8x32xf32>
    %137 = math.tanh %136 : vector<8x32xf32>
    %138 = arith.mulf %134, %97 : vector<8x32xf32>
    %139 = arith.mulf %133, %137 : vector<8x32xf32>
    %140 = arith.addf %138, %139 : vector<8x32xf32>
    %141 = math.tanh %140 : vector<8x32xf32>
    %142 = arith.mulf %135, %141 : vector<8x32xf32>
    %c3_i32 = arith.constant 3 : i32
    %c8_i32_32 = arith.constant 8 : i32
    %143 = arith.muli %c3_i32, %c8_i32_32 : i32
    %144 = tpu.assume_multiple %143, 8 : i32
    %145 = arith.index_cast %144 : i32 to index
    %c0_33 = arith.constant 0 : index
    %146 = vector.load %arg10[%145, %c0_33] : memref<64x128xf32, #tpu.memory_space<vmem>>, vector<8x128xf32>
    %147 = arith.truncf %122 : vector<8x32xf32> to vector<8x32xbf16>
    %cst_34 = arith.constant dense<0.000000e+00> : vector<8x128xf32>
    %148 = tpu.matmul %147, %7, %cst_34 {dimension_numbers = #tpu.dot_dimension_numbers<[1], [0], [0], [1], [0, 0, 1, 1], [], []>} : vector<8x32xbf16>, vector<32x128xbf16>, vector<8x128xf32> -> vector<8x128xf32>
    %149 = arith.addf %146, %148 : vector<8x128xf32>
    %150 = vector.extract_strided_slice %149 {offsets = [0, 0], sizes = [8, 96], strides = [1, 1]} : vector<8x128xf32> to vector<8x96xf32>
    %151 = arith.negf %150 : vector<8x96xf32>
    %152 = math.exp %151 : vector<8x96xf32>
    %cst_35 = arith.constant 1.000000e+00 : f32
    %153 = vector.broadcast %cst_35 : f32 to vector<8x96xf32>
    %154 = arith.addf %153, %152 : vector<8x96xf32>
    %155 = arith.divf %153, %154 : vector<8x96xf32>
    %156 = vector.extract_strided_slice %155 {offsets = [0, 0], sizes = [8, 32], strides = [1, 1]} : vector<8x96xf32> to vector<8x32xf32>
    %157 = vector.extract_strided_slice %155 {offsets = [0, 32], sizes = [8, 32], strides = [1, 1]} : vector<8x96xf32> to vector<8x32xf32>
    %158 = vector.extract_strided_slice %155 {offsets = [0, 64], sizes = [8, 32], strides = [1, 1]} : vector<8x96xf32> to vector<8x32xf32>
    %159 = vector.extract_strided_slice %149 {offsets = [0, 96], sizes = [8, 32], strides = [1, 1]} : vector<8x128xf32> to vector<8x32xf32>
    %160 = math.tanh %159 : vector<8x32xf32>
    %161 = arith.mulf %157, %120 : vector<8x32xf32>
    %162 = arith.mulf %156, %160 : vector<8x32xf32>
    %163 = arith.addf %161, %162 : vector<8x32xf32>
    %164 = math.tanh %163 : vector<8x32xf32>
    %165 = arith.mulf %158, %164 : vector<8x32xf32>
    %166 = tpu.concatenate %165, %142 in 1 : vector<8x32xf32>, vector<8x32xf32> -> vector<8x64xf32>
    %167 = arith.truncf %166 : vector<8x64xf32> to vector<8x64xbf16>
    %cst_36 = arith.constant dense<0.000000e+00> : vector<8x128xf32>
    %168 = tpu.matmul %167, %8, %cst_36 {dimension_numbers = #tpu.dot_dimension_numbers<[1], [0], [0], [1], [0, 0, 1, 1], [], []>} : vector<8x64xbf16>, vector<64x128xbf16>, vector<8x128xf32> -> vector<8x128xf32>
    %169 = arith.addf %168, %11 : vector<8x128xf32>
    %170 = vector.extract_strided_slice %169 {offsets = [0, 0], sizes = [8, 96], strides = [1, 1]} : vector<8x128xf32> to vector<8x96xf32>
    %171 = arith.negf %170 : vector<8x96xf32>
    %172 = math.exp %171 : vector<8x96xf32>
    %cst_37 = arith.constant 1.000000e+00 : f32
    %173 = vector.broadcast %cst_37 : f32 to vector<8x96xf32>
    %174 = arith.addf %173, %172 : vector<8x96xf32>
    %175 = arith.divf %173, %174 : vector<8x96xf32>
    %176 = vector.extract_strided_slice %175 {offsets = [0, 0], sizes = [8, 32], strides = [1, 1]} : vector<8x96xf32> to vector<8x32xf32>
    %177 = vector.extract_strided_slice %175 {offsets = [0, 32], sizes = [8, 32], strides = [1, 1]} : vector<8x96xf32> to vector<8x32xf32>
    %178 = vector.extract_strided_slice %175 {offsets = [0, 64], sizes = [8, 32], strides = [1, 1]} : vector<8x96xf32> to vector<8x32xf32>
    %179 = vector.extract_strided_slice %169 {offsets = [0, 96], sizes = [8, 32], strides = [1, 1]} : vector<8x128xf32> to vector<8x32xf32>
    %180 = math.tanh %179 : vector<8x32xf32>
    %181 = arith.mulf %177, %140 : vector<8x32xf32>
    %182 = arith.mulf %176, %180 : vector<8x32xf32>
    %183 = arith.addf %181, %182 : vector<8x32xf32>
    %184 = math.tanh %183 : vector<8x32xf32>
    %185 = arith.mulf %178, %184 : vector<8x32xf32>
    %c4_i32 = arith.constant 4 : i32
    %c8_i32_38 = arith.constant 8 : i32
    %186 = arith.muli %c4_i32, %c8_i32_38 : i32
    %187 = tpu.assume_multiple %186, 8 : i32
    %188 = arith.index_cast %187 : i32 to index
    %c0_39 = arith.constant 0 : index
    %189 = vector.load %arg10[%188, %c0_39] : memref<64x128xf32, #tpu.memory_space<vmem>>, vector<8x128xf32>
    %190 = arith.truncf %165 : vector<8x32xf32> to vector<8x32xbf16>
    %cst_40 = arith.constant dense<0.000000e+00> : vector<8x128xf32>
    %191 = tpu.matmul %190, %7, %cst_40 {dimension_numbers = #tpu.dot_dimension_numbers<[1], [0], [0], [1], [0, 0, 1, 1], [], []>} : vector<8x32xbf16>, vector<32x128xbf16>, vector<8x128xf32> -> vector<8x128xf32>
    %192 = arith.addf %189, %191 : vector<8x128xf32>
    %193 = vector.extract_strided_slice %192 {offsets = [0, 0], sizes = [8, 96], strides = [1, 1]} : vector<8x128xf32> to vector<8x96xf32>
    %194 = arith.negf %193 : vector<8x96xf32>
    %195 = math.exp %194 : vector<8x96xf32>
    %cst_41 = arith.constant 1.000000e+00 : f32
    %196 = vector.broadcast %cst_41 : f32 to vector<8x96xf32>
    %197 = arith.addf %196, %195 : vector<8x96xf32>
    %198 = arith.divf %196, %197 : vector<8x96xf32>
    %199 = vector.extract_strided_slice %198 {offsets = [0, 0], sizes = [8, 32], strides = [1, 1]} : vector<8x96xf32> to vector<8x32xf32>
    %200 = vector.extract_strided_slice %198 {offsets = [0, 32], sizes = [8, 32], strides = [1, 1]} : vector<8x96xf32> to vector<8x32xf32>
    %201 = vector.extract_strided_slice %198 {offsets = [0, 64], sizes = [8, 32], strides = [1, 1]} : vector<8x96xf32> to vector<8x32xf32>
    %202 = vector.extract_strided_slice %192 {offsets = [0, 96], sizes = [8, 32], strides = [1, 1]} : vector<8x128xf32> to vector<8x32xf32>
    %203 = math.tanh %202 : vector<8x32xf32>
    %204 = arith.mulf %200, %163 : vector<8x32xf32>
    %205 = arith.mulf %199, %203 : vector<8x32xf32>
    %206 = arith.addf %204, %205 : vector<8x32xf32>
    %207 = math.tanh %206 : vector<8x32xf32>
    %208 = arith.mulf %201, %207 : vector<8x32xf32>
    %209 = tpu.concatenate %208, %185 in 1 : vector<8x32xf32>, vector<8x32xf32> -> vector<8x64xf32>
    %210 = arith.truncf %209 : vector<8x64xf32> to vector<8x64xbf16>
    %cst_42 = arith.constant dense<0.000000e+00> : vector<8x128xf32>
    %211 = tpu.matmul %210, %8, %cst_42 {dimension_numbers = #tpu.dot_dimension_numbers<[1], [0], [0], [1], [0, 0, 1, 1], [], []>} : vector<8x64xbf16>, vector<64x128xbf16>, vector<8x128xf32> -> vector<8x128xf32>
    %212 = arith.addf %211, %11 : vector<8x128xf32>
    %213 = vector.extract_strided_slice %212 {offsets = [0, 0], sizes = [8, 96], strides = [1, 1]} : vector<8x128xf32> to vector<8x96xf32>
    %214 = arith.negf %213 : vector<8x96xf32>
    %215 = math.exp %214 : vector<8x96xf32>
    %cst_43 = arith.constant 1.000000e+00 : f32
    %216 = vector.broadcast %cst_43 : f32 to vector<8x96xf32>
    %217 = arith.addf %216, %215 : vector<8x96xf32>
    %218 = arith.divf %216, %217 : vector<8x96xf32>
    %219 = vector.extract_strided_slice %218 {offsets = [0, 0], sizes = [8, 32], strides = [1, 1]} : vector<8x96xf32> to vector<8x32xf32>
    %220 = vector.extract_strided_slice %218 {offsets = [0, 32], sizes = [8, 32], strides = [1, 1]} : vector<8x96xf32> to vector<8x32xf32>
    %221 = vector.extract_strided_slice %218 {offsets = [0, 64], sizes = [8, 32], strides = [1, 1]} : vector<8x96xf32> to vector<8x32xf32>
    %222 = vector.extract_strided_slice %212 {offsets = [0, 96], sizes = [8, 32], strides = [1, 1]} : vector<8x128xf32> to vector<8x32xf32>
    %223 = math.tanh %222 : vector<8x32xf32>
    %224 = arith.mulf %220, %183 : vector<8x32xf32>
    %225 = arith.mulf %219, %223 : vector<8x32xf32>
    %226 = arith.addf %224, %225 : vector<8x32xf32>
    %227 = math.tanh %226 : vector<8x32xf32>
    %228 = arith.mulf %221, %227 : vector<8x32xf32>
    %c5_i32 = arith.constant 5 : i32
    %c8_i32_44 = arith.constant 8 : i32
    %229 = arith.muli %c5_i32, %c8_i32_44 : i32
    %230 = tpu.assume_multiple %229, 8 : i32
    %231 = arith.index_cast %230 : i32 to index
    %c0_45 = arith.constant 0 : index
    %232 = vector.load %arg10[%231, %c0_45] : memref<64x128xf32, #tpu.memory_space<vmem>>, vector<8x128xf32>
    %233 = arith.truncf %208 : vector<8x32xf32> to vector<8x32xbf16>
    %cst_46 = arith.constant dense<0.000000e+00> : vector<8x128xf32>
    %234 = tpu.matmul %233, %7, %cst_46 {dimension_numbers = #tpu.dot_dimension_numbers<[1], [0], [0], [1], [0, 0, 1, 1], [], []>} : vector<8x32xbf16>, vector<32x128xbf16>, vector<8x128xf32> -> vector<8x128xf32>
    %235 = arith.addf %232, %234 : vector<8x128xf32>
    %236 = vector.extract_strided_slice %235 {offsets = [0, 0], sizes = [8, 96], strides = [1, 1]} : vector<8x128xf32> to vector<8x96xf32>
    %237 = arith.negf %236 : vector<8x96xf32>
    %238 = math.exp %237 : vector<8x96xf32>
    %cst_47 = arith.constant 1.000000e+00 : f32
    %239 = vector.broadcast %cst_47 : f32 to vector<8x96xf32>
    %240 = arith.addf %239, %238 : vector<8x96xf32>
    %241 = arith.divf %239, %240 : vector<8x96xf32>
    %242 = vector.extract_strided_slice %241 {offsets = [0, 0], sizes = [8, 32], strides = [1, 1]} : vector<8x96xf32> to vector<8x32xf32>
    %243 = vector.extract_strided_slice %241 {offsets = [0, 32], sizes = [8, 32], strides = [1, 1]} : vector<8x96xf32> to vector<8x32xf32>
    %244 = vector.extract_strided_slice %241 {offsets = [0, 64], sizes = [8, 32], strides = [1, 1]} : vector<8x96xf32> to vector<8x32xf32>
    %245 = vector.extract_strided_slice %235 {offsets = [0, 96], sizes = [8, 32], strides = [1, 1]} : vector<8x128xf32> to vector<8x32xf32>
    %246 = math.tanh %245 : vector<8x32xf32>
    %247 = arith.mulf %243, %206 : vector<8x32xf32>
    %248 = arith.mulf %242, %246 : vector<8x32xf32>
    %249 = arith.addf %247, %248 : vector<8x32xf32>
    %250 = math.tanh %249 : vector<8x32xf32>
    %251 = arith.mulf %244, %250 : vector<8x32xf32>
    %252 = tpu.concatenate %251, %228 in 1 : vector<8x32xf32>, vector<8x32xf32> -> vector<8x64xf32>
    %253 = arith.truncf %252 : vector<8x64xf32> to vector<8x64xbf16>
    %cst_48 = arith.constant dense<0.000000e+00> : vector<8x128xf32>
    %254 = tpu.matmul %253, %8, %cst_48 {dimension_numbers = #tpu.dot_dimension_numbers<[1], [0], [0], [1], [0, 0, 1, 1], [], []>} : vector<8x64xbf16>, vector<64x128xbf16>, vector<8x128xf32> -> vector<8x128xf32>
    %255 = arith.addf %254, %11 : vector<8x128xf32>
    %256 = vector.extract_strided_slice %255 {offsets = [0, 0], sizes = [8, 96], strides = [1, 1]} : vector<8x128xf32> to vector<8x96xf32>
    %257 = arith.negf %256 : vector<8x96xf32>
    %258 = math.exp %257 : vector<8x96xf32>
    %cst_49 = arith.constant 1.000000e+00 : f32
    %259 = vector.broadcast %cst_49 : f32 to vector<8x96xf32>
    %260 = arith.addf %259, %258 : vector<8x96xf32>
    %261 = arith.divf %259, %260 : vector<8x96xf32>
    %262 = vector.extract_strided_slice %261 {offsets = [0, 0], sizes = [8, 32], strides = [1, 1]} : vector<8x96xf32> to vector<8x32xf32>
    %263 = vector.extract_strided_slice %261 {offsets = [0, 32], sizes = [8, 32], strides = [1, 1]} : vector<8x96xf32> to vector<8x32xf32>
    %264 = vector.extract_strided_slice %261 {offsets = [0, 64], sizes = [8, 32], strides = [1, 1]} : vector<8x96xf32> to vector<8x32xf32>
    %265 = vector.extract_strided_slice %255 {offsets = [0, 96], sizes = [8, 32], strides = [1, 1]} : vector<8x128xf32> to vector<8x32xf32>
    %266 = math.tanh %265 : vector<8x32xf32>
    %267 = arith.mulf %263, %226 : vector<8x32xf32>
    %268 = arith.mulf %262, %266 : vector<8x32xf32>
    %269 = arith.addf %267, %268 : vector<8x32xf32>
    %270 = math.tanh %269 : vector<8x32xf32>
    %271 = arith.mulf %264, %270 : vector<8x32xf32>
    %c6_i32 = arith.constant 6 : i32
    %c8_i32_50 = arith.constant 8 : i32
    %272 = arith.muli %c6_i32, %c8_i32_50 : i32
    %273 = tpu.assume_multiple %272, 8 : i32
    %274 = arith.index_cast %273 : i32 to index
    %c0_51 = arith.constant 0 : index
    %275 = vector.load %arg10[%274, %c0_51] : memref<64x128xf32, #tpu.memory_space<vmem>>, vector<8x128xf32>
    %276 = arith.truncf %251 : vector<8x32xf32> to vector<8x32xbf16>
    %cst_52 = arith.constant dense<0.000000e+00> : vector<8x128xf32>
    %277 = tpu.matmul %276, %7, %cst_52 {dimension_numbers = #tpu.dot_dimension_numbers<[1], [0], [0], [1], [0, 0, 1, 1], [], []>} : vector<8x32xbf16>, vector<32x128xbf16>, vector<8x128xf32> -> vector<8x128xf32>
    %278 = arith.addf %275, %277 : vector<8x128xf32>
    %279 = vector.extract_strided_slice %278 {offsets = [0, 0], sizes = [8, 96], strides = [1, 1]} : vector<8x128xf32> to vector<8x96xf32>
    %280 = arith.negf %279 : vector<8x96xf32>
    %281 = math.exp %280 : vector<8x96xf32>
    %cst_53 = arith.constant 1.000000e+00 : f32
    %282 = vector.broadcast %cst_53 : f32 to vector<8x96xf32>
    %283 = arith.addf %282, %281 : vector<8x96xf32>
    %284 = arith.divf %282, %283 : vector<8x96xf32>
    %285 = vector.extract_strided_slice %284 {offsets = [0, 0], sizes = [8, 32], strides = [1, 1]} : vector<8x96xf32> to vector<8x32xf32>
    %286 = vector.extract_strided_slice %284 {offsets = [0, 32], sizes = [8, 32], strides = [1, 1]} : vector<8x96xf32> to vector<8x32xf32>
    %287 = vector.extract_strided_slice %284 {offsets = [0, 64], sizes = [8, 32], strides = [1, 1]} : vector<8x96xf32> to vector<8x32xf32>
    %288 = vector.extract_strided_slice %278 {offsets = [0, 96], sizes = [8, 32], strides = [1, 1]} : vector<8x128xf32> to vector<8x32xf32>
    %289 = math.tanh %288 : vector<8x32xf32>
    %290 = arith.mulf %286, %249 : vector<8x32xf32>
    %291 = arith.mulf %285, %289 : vector<8x32xf32>
    %292 = arith.addf %290, %291 : vector<8x32xf32>
    %293 = math.tanh %292 : vector<8x32xf32>
    %294 = arith.mulf %287, %293 : vector<8x32xf32>
    %295 = tpu.concatenate %294, %271 in 1 : vector<8x32xf32>, vector<8x32xf32> -> vector<8x64xf32>
    %296 = arith.truncf %295 : vector<8x64xf32> to vector<8x64xbf16>
    %cst_54 = arith.constant dense<0.000000e+00> : vector<8x128xf32>
    %297 = tpu.matmul %296, %8, %cst_54 {dimension_numbers = #tpu.dot_dimension_numbers<[1], [0], [0], [1], [0, 0, 1, 1], [], []>} : vector<8x64xbf16>, vector<64x128xbf16>, vector<8x128xf32> -> vector<8x128xf32>
    %298 = arith.addf %297, %11 : vector<8x128xf32>
    %299 = vector.extract_strided_slice %298 {offsets = [0, 0], sizes = [8, 96], strides = [1, 1]} : vector<8x128xf32> to vector<8x96xf32>
    %300 = arith.negf %299 : vector<8x96xf32>
    %301 = math.exp %300 : vector<8x96xf32>
    %cst_55 = arith.constant 1.000000e+00 : f32
    %302 = vector.broadcast %cst_55 : f32 to vector<8x96xf32>
    %303 = arith.addf %302, %301 : vector<8x96xf32>
    %304 = arith.divf %302, %303 : vector<8x96xf32>
    %305 = vector.extract_strided_slice %304 {offsets = [0, 0], sizes = [8, 32], strides = [1, 1]} : vector<8x96xf32> to vector<8x32xf32>
    %306 = vector.extract_strided_slice %304 {offsets = [0, 32], sizes = [8, 32], strides = [1, 1]} : vector<8x96xf32> to vector<8x32xf32>
    %307 = vector.extract_strided_slice %304 {offsets = [0, 64], sizes = [8, 32], strides = [1, 1]} : vector<8x96xf32> to vector<8x32xf32>
    %308 = vector.extract_strided_slice %298 {offsets = [0, 96], sizes = [8, 32], strides = [1, 1]} : vector<8x128xf32> to vector<8x32xf32>
    %309 = math.tanh %308 : vector<8x32xf32>
    %310 = arith.mulf %306, %269 : vector<8x32xf32>
    %311 = arith.mulf %305, %309 : vector<8x32xf32>
    %312 = arith.addf %310, %311 : vector<8x32xf32>
    %313 = math.tanh %312 : vector<8x32xf32>
    %314 = arith.mulf %307, %313 : vector<8x32xf32>
    %c7_i32 = arith.constant 7 : i32
    %c8_i32_56 = arith.constant 8 : i32
    %315 = arith.muli %c7_i32, %c8_i32_56 : i32
    %316 = tpu.assume_multiple %315, 8 : i32
    %317 = arith.index_cast %316 : i32 to index
    %c0_57 = arith.constant 0 : index
    %318 = vector.load %arg10[%317, %c0_57] : memref<64x128xf32, #tpu.memory_space<vmem>>, vector<8x128xf32>
    %319 = arith.truncf %294 : vector<8x32xf32> to vector<8x32xbf16>
    %cst_58 = arith.constant dense<0.000000e+00> : vector<8x128xf32>
    %320 = tpu.matmul %319, %7, %cst_58 {dimension_numbers = #tpu.dot_dimension_numbers<[1], [0], [0], [1], [0, 0, 1, 1], [], []>} : vector<8x32xbf16>, vector<32x128xbf16>, vector<8x128xf32> -> vector<8x128xf32>
    %321 = arith.addf %318, %320 : vector<8x128xf32>
    %322 = vector.extract_strided_slice %321 {offsets = [0, 0], sizes = [8, 96], strides = [1, 1]} : vector<8x128xf32> to vector<8x96xf32>
    %323 = arith.negf %322 : vector<8x96xf32>
    %324 = math.exp %323 : vector<8x96xf32>
    %cst_59 = arith.constant 1.000000e+00 : f32
    %325 = vector.broadcast %cst_59 : f32 to vector<8x96xf32>
    %326 = arith.addf %325, %324 : vector<8x96xf32>
    %327 = arith.divf %325, %326 : vector<8x96xf32>
    %328 = vector.extract_strided_slice %327 {offsets = [0, 0], sizes = [8, 32], strides = [1, 1]} : vector<8x96xf32> to vector<8x32xf32>
    %329 = vector.extract_strided_slice %327 {offsets = [0, 32], sizes = [8, 32], strides = [1, 1]} : vector<8x96xf32> to vector<8x32xf32>
    %330 = vector.extract_strided_slice %327 {offsets = [0, 64], sizes = [8, 32], strides = [1, 1]} : vector<8x96xf32> to vector<8x32xf32>
    %331 = vector.extract_strided_slice %321 {offsets = [0, 96], sizes = [8, 32], strides = [1, 1]} : vector<8x128xf32> to vector<8x32xf32>
    %332 = math.tanh %331 : vector<8x32xf32>
    %333 = arith.mulf %329, %292 : vector<8x32xf32>
    %334 = arith.mulf %328, %332 : vector<8x32xf32>
    %335 = arith.addf %333, %334 : vector<8x32xf32>
    %336 = math.tanh %335 : vector<8x32xf32>
    %337 = arith.mulf %330, %336 : vector<8x32xf32>
    %338 = tpu.concatenate %337, %314 in 1 : vector<8x32xf32>, vector<8x32xf32> -> vector<8x64xf32>
    %339 = arith.truncf %338 : vector<8x64xf32> to vector<8x64xbf16>
    %cst_60 = arith.constant dense<0.000000e+00> : vector<8x128xf32>
    %340 = tpu.matmul %339, %8, %cst_60 {dimension_numbers = #tpu.dot_dimension_numbers<[1], [0], [0], [1], [0, 0, 1, 1], [], []>} : vector<8x64xbf16>, vector<64x128xbf16>, vector<8x128xf32> -> vector<8x128xf32>
    %341 = arith.addf %340, %11 : vector<8x128xf32>
    %342 = vector.extract_strided_slice %341 {offsets = [0, 0], sizes = [8, 96], strides = [1, 1]} : vector<8x128xf32> to vector<8x96xf32>
    %343 = arith.negf %342 : vector<8x96xf32>
    %344 = math.exp %343 : vector<8x96xf32>
    %cst_61 = arith.constant 1.000000e+00 : f32
    %345 = vector.broadcast %cst_61 : f32 to vector<8x96xf32>
    %346 = arith.addf %345, %344 : vector<8x96xf32>
    %347 = arith.divf %345, %346 : vector<8x96xf32>
    %348 = vector.extract_strided_slice %347 {offsets = [0, 0], sizes = [8, 32], strides = [1, 1]} : vector<8x96xf32> to vector<8x32xf32>
    %349 = vector.extract_strided_slice %347 {offsets = [0, 32], sizes = [8, 32], strides = [1, 1]} : vector<8x96xf32> to vector<8x32xf32>
    %350 = vector.extract_strided_slice %347 {offsets = [0, 64], sizes = [8, 32], strides = [1, 1]} : vector<8x96xf32> to vector<8x32xf32>
    %351 = vector.extract_strided_slice %341 {offsets = [0, 96], sizes = [8, 32], strides = [1, 1]} : vector<8x128xf32> to vector<8x32xf32>
    %352 = math.tanh %351 : vector<8x32xf32>
    %353 = arith.mulf %349, %312 : vector<8x32xf32>
    %354 = arith.mulf %348, %352 : vector<8x32xf32>
    %355 = arith.addf %353, %354 : vector<8x32xf32>
    %356 = math.tanh %355 : vector<8x32xf32>
    %357 = arith.mulf %350, %356 : vector<8x32xf32>
    %c8_i32_62 = arith.constant 8 : i32
    %358 = arith.truncf %357 : vector<8x32xf32> to vector<8x32xbf16>
    %c0_63 = arith.constant 0 : index
    %c0_64 = arith.constant 0 : index
    %359 = vector.load %arg7[%c0_63, %c0_64] : memref<32x128xbf16, #tpu.memory_space<vmem>>, vector<32x128xbf16>
    %cst_65 = arith.constant dense<0.000000e+00> : vector<8x128xf32>
    %360 = tpu.matmul %358, %359, %cst_65 {dimension_numbers = #tpu.dot_dimension_numbers<[1], [0], [0], [1], [0, 0, 1, 1], [], []>} : vector<8x32xbf16>, vector<32x128xbf16>, vector<8x128xf32> -> vector<8x128xf32>
    %c0_66 = arith.constant 0 : index
    %c0_67 = arith.constant 0 : index
    %361 = vector.load %arg8[%c0_66, %c0_67] : memref<1x128xf32, #tpu.memory_space<vmem>>, vector<1x128xf32>
    %362 = vector.broadcast %361 : vector<1x128xf32> to vector<8x128xf32>
    %363 = arith.addf %360, %362 : vector<8x128xf32>
    %c0_68 = arith.constant 0 : index
    %c0_69 = arith.constant 0 : index
    %364 = vector.load %arg9[%c0_68, %c0_69] : memref<8x128xf32, #tpu.memory_space<vmem>>, vector<8x128xf32>
    tpu.vector_store %arg9[%c0_68, %c0_69], %363 {strides = array<i32>} : memref<8x128xf32, #tpu.memory_space<vmem>>, vector<8x128xf32>,
    return
  }
  func.func @transform_0(%arg0: i32) -> (i32, i32) {
    %c0_i32 = arith.constant 0 : i32
    %c0_i32_0 = arith.constant 0 : i32
    %c0_i32_1 = arith.constant 0 : i32
    return %c0_i32, %c0_i32_0 : i32, i32
  }
  func.func @transform_1(%arg0: i32) -> (i32, i32) {
    %c0_i32 = arith.constant 0 : i32
    %c0_i32_0 = arith.constant 0 : i32
    %c0_i32_1 = arith.constant 0 : i32
    return %c0_i32, %c0_i32_0 : i32, i32
  }
  func.func @transform_2(%arg0: i32) -> (i32, i32) {
    %c0_i32 = arith.constant 0 : i32
    %c0_i32_0 = arith.constant 0 : i32
    %c0_i32_1 = arith.constant 0 : i32
    return %c0_i32, %c0_i32_0 : i32, i32
  }
  func.func @transform_3(%arg0: i32) -> (i32, i32) {
    %c0_i32 = arith.constant 0 : i32
    %c0_i32_0 = arith.constant 0 : i32
    %c0_i32_1 = arith.constant 0 : i32
    return %c0_i32, %c0_i32_0 : i32, i32
  }
  func.func @transform_4(%arg0: i32) -> (i32, i32) {
    %c0_i32 = arith.constant 0 : i32
    %c0_i32_0 = arith.constant 0 : i32
    %c0_i32_1 = arith.constant 0 : i32
    return %c0_i32, %c0_i32_0 : i32, i32
  }
  func.func @transform_5(%arg0: i32) -> (i32, i32) {
    %c0_i32 = arith.constant 0 : i32
    %c0_i32_0 = arith.constant 0 : i32
    %c0_i32_1 = arith.constant 0 : i32
    return %c0_i32, %c0_i32_0 : i32, i32
  }
  func.func @transform_6(%arg0: i32) -> (i32, i32) {
    %c0_i32 = arith.constant 0 : i32
    %c0_i32_0 = arith.constant 0 : i32
    %c0_i32_1 = arith.constant 0 : i32
    return %c0_i32, %c0_i32_0 : i32, i32
  }
  func.func @transform_7(%arg0: i32) -> (i32, i32) {
    %c0_i32 = arith.constant 0 : i32
    %c0_i32_0 = arith.constant 0 : i32
    %c0_i32_1 = arith.constant 0 : i32
    return %c0_i32, %c0_i32_0 : i32, i32
  }
  func.func @transform_8(%arg0: i32) -> (i32, i32) {
    %c0_i32 = arith.constant 0 : i32
    %c0_i32_0 = arith.constant 0 : i32
    %c0_i32_1 = arith.constant 0 : i32
    return %c0_i32, %c0_i32_0 : i32, i32
  }
}

</mosaic_0001>

<bundles_post_ra>
// kernel: lstm_classifier_forward.1
= control target key start
LH: loop header
LB: loop body
LE: loop exit
PB: predicated region body
PF: predicated region fallthrough
CT: control target
= control target key end

     0   :  { %v1940_v0 = vmov 0.0   ;;  %vm1941_vm0 = vmmov 0   ;;  %vm73_vm1 = vcmask 130048   ;;  %v1942_v6 = vmov 0   ;;  %s1943_s15 = smov 32   ;;  %s1944_s27 = smov 64   ;;  %s2377_s1 = inlined_call_operand.vmem [shape: bf16[16,128], index: 1, kind: input, shape index: {}]   ;;  %s2378_s2 = inlined_call_operand.vmem [shape: bf16[32,128], index: 2, kind: input, shape index: {}]   ;;  %s2379_s0 = inlined_call_operand.vmem [shape: bf16[64,16], index: 0, kind: input, shape index: {}]   ;;  %s2380_s3 = inlined_call_operand.vmem [shape: f32[1,128], index: 3, kind: input, shape index: {}]   ;;  %s2381_s4 = inlined_call_operand.vmem [shape: bf16[64,128], index: 4, kind: input, shape index: {}]   ;;  %s2382_s5 = inlined_call_operand.vmem [shape: f32[1,128], index: 5, kind: input, shape index: {}]   ;;  %s2383_s6 = inlined_call_operand.vmem [shape: bf16[32,128], index: 6, kind: input, shape index: {}]   ;;  %s2384_s7 = inlined_call_operand.vmem [shape: f32[1,128], index: 7, kind: input, shape index: {}]   ;;  %s2385_s8 = inlined_call_operand.vmem [shape: f32[8,128], index: 8, kind: output, shape index: {}]  }
   0x1   :  { %1624 = vmatprep.subr.bf16.mxu1 %v1940_v0  ;;  %v1798_v1 = vld [vmem:[%s2377_s1] sm:$0xff]   ;;  %1628 = vmatprep.mubr.msk.bf16.mxu1 %vm1941_vm0, %v1940_v0  ;;  %v2000_v2 = vld [vmem:[%s2378_s2 + $0x8] sm:$0xff]   ;;  %v1805_v26 = vld [vmem:[%s2379_s0 + $0x10] sm:$0xff]   ;;  %vm191_vm2 = vcmask 261120   ;;  %vm290_vm3 = vcmask 523264  }
   0x2   :  { %1614 = vmatprep.subr.bf16.mxu0 %v1798_v1  ;;  %v1800_v3 = vld [vmem:[%s2379_s0] sm:$0xff]   ;;  %1625 = vmatpush3.bf16.msra.mxu1 %v2000_v2  ;;  %v1801_v4 = vld [vmem:[%s2379_s0 + $0x8] sm:$0xff]   ;;  %v1806_v27 = vld [vmem:[%s2379_s0 + $0x18] sm:$0xff]  }
   0x3   :  { %1615 = vmatpush3.bf16.msra.mxu0 %v1798_v1  ;;  %1616 = vmatprep.mubr.msk.bf16.mxu0 %vm73_vm1, %v1800_v3  ;;  %v2014_v5 = vld [vmem:[%s2378_s2] sm:$0xff]   ;;  %v2048_v28 = vld [vmem:[%s2381_s4 + $0x18] sm:$0xff]   ;;  %v2055_v29 = vld [vmem:[%s2381_s4 + $0x10] sm:$0xff]  }
   0x4   :  { %1626 = vmatprep.subr.bf16.mxu1 %v1940_v0  ;;  %1632 = vmatprep.subr.bf16.mxu0 %v1940_v0  ;;  %v2031_v8 = vld [vmem:[%s2380_s3] ss:$0 sm:$0xff]  ;;  %v2065_v30 = vld [vmem:[%s2381_s4 + $0x8] sm:$0xff]  }
   0x5   :  { %v2074_v32 = vld [vmem:[%s2381_s4] sm:$0xff]  }
   0x6   :  { %1617 = vmatmul.mubr.msk.bf16.vlgmr.msra.gmra.mxu0 %vm73_vm1, %v1801_v4  ;;  %1627 = vmatpush3.bf16.msra.mxu1 %v2014_v5  ;;  %v2113_v47 = vld [vmem:[%s2382_s5] ss:$0 sm:$0xff]  ;;  %s1945_s5 = smov 96  }
   0x7   :  { %1644 = vmatprep.subr.bf16.mxu1 %v1940_v0  ;;  %1620 = vmatprep.mubr.msk.bf16.mxu0 %vm73_vm1, %v1805_v26 }
   0x8   :  { %1633 = vmatpush3.bf16.msra.mxu0 %v2048_v28 }
   0x9   :  { %1629 = vmatmul.mubr.bf16.vlgmr.msra.gmra.mxu1 %v1942_v6  ;;  %1634 = vmatprep.subr.bf16.mxu0 %v1940_v0 }
   0xa   :  { %1645 = vmatpush3.bf16.msra.mxu1 %v2000_v2  ;;  %1648 = vmatprep.mubr.msk.bf16.mxu1 %vm1941_vm0, %v1940_v0 }
   0xb   :  { %1646 = vmatprep.subr.bf16.mxu1 %v1940_v0 }
   0xc   :  { %1635 = vmatpush3.bf16.msra.mxu0 %v2055_v29 }
   0xd   :  { %1636 = vmatprep.subr.bf16.mxu0 %v1940_v0 }
   0xe   :  { %1647 = vmatpush3.bf16.msra.mxu1 %v2014_v5  ;;  %1621 = vmatmul.mubr.msk.bf16.gmra.mxu0 %vm73_vm1, %v1806_v27 }
   0xf   :  { %1652 = vmatprep.subr.bf16.mxu1 %v1940_v0  ;;  %1640 = vmatprep.mubr.msk.bf16.mxu0 %vm1941_vm0, %v1940_v0 }
  0x10   :  { %1637 = vmatpush3.bf16.msra.mxu0 %v2065_v30 }
  0x11   :  { %1638 = vmatprep.subr.bf16.mxu0 %v1940_v0 }
  0x14   :  { %1639 = vmatpush3.bf16.msra.mxu0 %v2074_v32 }
  0x15   :  { %1664 = vmatprep.subr.bf16.mxu0 %v1940_v0 }
  0xc6   :  { %v2026_v7 = vpop.f32.mrf.mxu0 }
  0xc8   :  { %v120_v9 = vpop.f32.mrf.mxu0 }
  0xc9   :  { %v121_v10 = vadd.f32 %v2031_v8, %v120_v9  ;;  %v229_v11 = vpop.f32.mrf.mxu1 }
  0xca   :  { %v2099_v40 = vpop.f32.mrf.mxu0 }
  0xcb   :  { %v235_v12 = vadd.f32 %v229_v11, %v121_v10  ;;  %v1630_v13 = vpop.f32.mrf.mxu1 }
  0xcc   :  { %v123_v41 = vpop.f32.mrf.mxu0 }
  0xcd   :  { %1811 = vtanh.f32 %v235_v12  ;;  %v232_v14 = vpop.f32.mrf.mxu1  ;;  %v1503_v17 = vmul.f32 -1.442695, %v235_v12  ;;  %v124_v46 = vadd.f32 %v2031_v8, %v123_v41 }
  0xce   :  { %v2101_v42 = vpop.f32.mrf.mxu0 }
  0xcf   :  { %v1631_v15 = vpop.f32.mrf.mxu1  ;;  %1813 = vpow2.f32 %v1503_v17 }
  0xd0   :  { %v2103_v43 = vpop.f32.mrf.mxu0 }
  0xd2   :  { %v2105_v44 = vpop.f32.mrf.mxu0 }
  0xd4   :  { %v2107_v45 = vpop.f32.mrf.mxu0 }
  0xda   :  { %v1812_v16 = vpop.eup %1811 }
  0xdb   :  { %245 = vrot.lane.b32.xlu0 %v1812_v16, %s1943_s15 }
  0xdc   :  { %v1814_v18 = vpop.eup %1813 }
  0xdd   :  { %v239_v19 = vadd.f32 1.0, %v1814_v18 }
  0xdf   :  { %1815 = vrcp.f32 %v239_v19 }
  0xec   :  { %v1816_v20 = vpop.eup %1815 }
  0xed   :  { %v243_v23 = vmul.f32 0.0, %v1816_v20 }
 0x14d   :  { %v246_v21 = vpop.permute.xlu0 %245 }
 0x14e   :  { %v248_v22 = vmul.f32 %v1816_v20, %v246_v21 }
 0x150   :  { %250 = vrot.lane.b32.xlu0 %v248_v22, %s1943_s15 }
 0x1c2   :  { %v251_v24 = vpop.permute.xlu0 %250 }
 0x1c3   :  { %v2036_v25 = vadd.f32 %v251_v24, %v243_v23 }
 0x1c5   :  { %1817 = vtanh.f32 %v2036_v25 }
 0x1d2   :  { %v1818_v31 = vpop.eup %1817 }
 0x1d3   :  { %256 = vrot.lane.b32.xlu1 %v1818_v31, %s1943_s15 }
 0x245   :  { %v257_v33 = vpop.permute.xlu1 %256 }
 0x246   :  { %v259_v34 = vmul.f32 %v1816_v20, %v257_v33 }
 0x248   :  { %v360_v35 = vpack.c.bf16 %v259_v34, %v259_v34  ;;  %261 = vrot.lane.b32.xlu1 %v259_v34, %s1944_s27 }
 0x24a   :  { %362 = vrot.lane.b32.xlu0 %v360_v35, %s1944_s27  ;;  %v129_v35 = vadd.f32 %v2026_v7, %v2031_v8 }
 0x2ba   :  { %v262_v36 = vpop.permute.xlu1 %261 }
 0x2bb   :  { %v264_v37 = vsel %vm191_vm2, %v262_v36, 0.0 }
 0x2bc   :  { %v265_v38 = vpack.c.bf16 %v264_v37, %v264_v37  ;;  %v363_v39 = vpop.permute.xlu0 %362 }
 0x2bd   :  { %1649 = vmatmul.mubr.msk.bf16.vlgmr.msra.gmra.mxu1 %vm191_vm2, %v363_v39 }
 0x2be   :  { %1641 = vmatmul.mubr.msk.bf16.vlgmr.msra.gmra.mxu0 %vm290_vm3, %v265_v38  ;;  %1653 = vmatpush3.bf16.msra.mxu1 %v2048_v28 }
 0x2bf   :  { %1654 = vmatprep.subr.bf16.mxu1 %v1940_v0  ;;  %1665 = vmatpush3.bf16.msra.mxu0 %v2000_v2 }
 0x2c0   :  { %1666 = vmatprep.subr.bf16.mxu0 %v1940_v0  ;;  %1660 = vmatprep.mubr.msk.bf16.mxu1 %vm1941_vm0, %v1940_v0 }
 0x2c1   :  { %1668 = vmatprep.mubr.msk.bf16.mxu0 %vm1941_vm0, %v1940_v0 }
 0x2c2   :  { %1655 = vmatpush3.bf16.msra.mxu1 %v2055_v29 }
 0x2c3   :  { %1656 = vmatprep.subr.bf16.mxu1 %v1940_v0  ;;  %1667 = vmatpush3.bf16.msra.mxu0 %v2014_v5 }
 0x2c4   :  { %1672 = vmatprep.subr.bf16.mxu0 %v1940_v0 }
 0x2c6   :  { %1657 = vmatpush3.bf16.msra.mxu1 %v2065_v30 }
 0x2c7   :  { %1658 = vmatprep.subr.bf16.mxu1 %v1940_v0 }
 0x2ca   :  { %1659 = vmatpush3.bf16.msra.mxu1 %v2074_v32 }
 0x2cb   :  { %1684 = vmatprep.subr.bf16.mxu1 %v1940_v0 }
 0x37d   :  { %v401_v48 = vpop.f32.mrf.mxu1 }
 0x37e   :  { %v407_v49 = vadd.f32 %v401_v48, %v124_v46  ;;  %v328_v50 = vpop.f32.mrf.mxu0 }
 0x37f   :  { %v329_v51 = vadd.f32 %v2113_v47, %v328_v50  ;;  %v1650_v52 = vpop.f32.mrf.mxu1 }
 0x380   :  { %1819 = vtanh.f32 %v407_v49  ;;  %v1642_v53 = vpop.f32.mrf.mxu0  ;;  %v1511_v60 = vmul.f32 -1.442695, %v407_v49 }
 0x381   :  { %1821 = vtanh.f32 %v329_v51  ;;  %v404_v54 = vpop.f32.mrf.mxu1  ;;  %v1509_v61 = vmul.f32 -1.442695, %v329_v51 }
 0x382   :  { %v331_v55 = vpop.f32.mrf.mxu0  ;;  %1823 = vpow2.f32 %v1511_v60 }
 0x383   :  { %v1651_v56 = vpop.f32.mrf.mxu1  ;;  %1825 = vpow2.f32 %v1509_v61 }
 0x384   :  { %v1643_v57 = vpop.f32.mrf.mxu0 }
 0x38d   :  { %v1820_v58 = vpop.eup %1819 }
 0x38e   :  { %v1822_v59 = vpop.eup %1821  ;;  %417 = vrot.lane.b32.xlu0 %v1820_v58, %s1943_s15 }
 0x38f   :  { %343 = vrot.lane.b32.xlu1 %v1822_v59, %s1943_s15  ;;  %v1824_v62 = vpop.eup %1823 }
 0x390   :  { %v1826_v63 = vpop.eup %1825  ;;  %v411_v1 = vadd.f32 1.0, %v1824_v62 }
 0x391   :  { %v337_v3 = vadd.f32 1.0, %v1826_v63 }
 0x392   :  { %1827 = vrcp.f32 %v411_v1 }
 0x393   :  { %1829 = vrcp.f32 %v337_v3 }
 0x39f   :  { %v1828_v4 = vpop.eup %1827 }
 0x3a0   :  { %v1830_v9 = vpop.eup %1829  ;;  %v415_v13 = vmul.f32 %v1828_v4, %v2036_v25 }
 0x3a1   :  { %v341_v15 = vmul.f32 0.0, %v1830_v9 }
 0x400   :  { %v418_v6 = vpop.permute.xlu0 %417 }
 0x401   :  { %v420_v10 = vmul.f32 %v1828_v4, %v418_v6  ;;  %v344_v11 = vpop.permute.xlu1 %343 }
 0x402   :  { %v346_v12 = vmul.f32 %v1830_v9, %v344_v11 }
 0x403   :  { %422 = vrot.lane.b32.xlu0 %v420_v10, %s1943_s15 }
 0x404   :  { %348 = vrot.lane.b32.xlu1 %v346_v12, %s1943_s15 }
 0x475   :  { %v423_v14 = vpop.permute.xlu0 %422 }
 0x476   :  { %v2121_v16 = vadd.f32 %v423_v14, %v415_v13  ;;  %v349_v17 = vpop.permute.xlu1 %348 }
 0x477   :  { %v2123_v18 = vadd.f32 %v349_v17, %v341_v15 }
 0x478   :  { %1831 = vtanh.f32 %v2121_v16 }
 0x479   :  { %1833 = vtanh.f32 %v2123_v18 }
 0x485   :  { %v1832_v19 = vpop.eup %1831 }
 0x486   :  { %v1834_v20 = vpop.eup %1833  ;;  %428 = vrot.lane.b32.xlu0 %v1832_v19, %s1943_s15 }
 0x487   :  { %354 = vrot.lane.b32.xlu1 %v1834_v20, %s1943_s15 }
 0x4f8   :  { %v429_v21 = vpop.permute.xlu0 %428 }
 0x4f9   :  { %v431_v22 = vmul.f32 %v1828_v4, %v429_v21  ;;  %v355_v23 = vpop.permute.xlu1 %354 }
 0x4fa   :  { %v357_v24 = vmul.f32 %v1830_v9, %v355_v23 }
 0x4fb   :  { %433 = vrot.lane.b32.xlu1 %v431_v22, %s1944_s27  ;;  %v511_v25 = vpack.c.bf16 %v431_v22, %v431_v22 }
 0x4fc   :  { %437 = vrot.lane.b32.xlu0 %v357_v24, %s1945_s5  ;;  %v132_v24 = vadd.f32 %v2099_v40, %v2031_v8 }
 0x4ff   :  { %513 = vrot.lane.b32.xlu1 %v511_v25, %s1944_s27 }
 0x56d   :  { %v434_v26 = vpop.permute.xlu1 %433 }
 0x56e   :  { %v438_v27 = vpop.permute.xlu0 %437 }
 0x56f   :  { %v440_v31 = vsel %vm191_vm2, %v434_v26, %v438_v27 }
 0x570   :  { %v441_v33 = vpack.c.bf16 %v440_v31, %v440_v31 }
 0x571   :  { %v514_v34 = vpop.permute.xlu1 %513 }
 0x572   :  { %1661 = vmatmul.mubr.msk.bf16.vlgmr.msra.gmra.mxu1 %vm290_vm3, %v441_v33  ;;  %1669 = vmatmul.mubr.msk.bf16.vlgmr.msra.gmra.mxu0 %vm191_vm2, %v514_v34 }
 0x573   :  { %1673 = vmatpush3.bf16.msra.mxu0 %v2048_v28  ;;  %1685 = vmatpush3.bf16.msra.mxu1 %v2000_v2 }
 0x574   :  { %1674 = vmatprep.subr.bf16.mxu0 %v1940_v0  ;;  %1686 = vmatprep.subr.bf16.mxu1 %v1940_v0 }
 0x575   :  { %1680 = vmatprep.mubr.msk.bf16.mxu0 %vm1941_vm0, %v1940_v0  ;;  %1688 = vmatprep.mubr.msk.bf16.mxu1 %vm1941_vm0, %v1940_v0 }
 0x577   :  { %1675 = vmatpush3.bf16.msra.mxu0 %v2055_v29  ;;  %1687 = vmatpush3.bf16.msra.mxu1 %v2014_v5 }
 0x578   :  { %1676 = vmatprep.subr.bf16.mxu0 %v1940_v0  ;;  %1692 = vmatprep.subr.bf16.mxu1 %v1940_v0 }
 0x57b   :  { %1677 = vmatpush3.bf16.msra.mxu0 %v2065_v30 }
 0x57c   :  { %1678 = vmatprep.subr.bf16.mxu0 %v1940_v0 }
 0x57f   :  { %1679 = vmatpush3.bf16.msra.mxu0 %v2074_v32 }
 0x580   :  { %1704 = vmatprep.subr.bf16.mxu0 %v1940_v0 }
 0x632   :  { %v479_v36 = vpop.f32.mrf.mxu1  ;;  %v552_v37 = vpop.f32.mrf.mxu0 }
 0x633   :  { %v480_v38 = vadd.f32 %v2113_v47, %v479_v36  ;;  %v558_v39 = vadd.f32 %v552_v37, %v129_v35 }
 0x634   :  { %v1662_v41 = vpop.f32.mrf.mxu1  ;;  %v1670_v46 = vpop.f32.mrf.mxu0 }
 0x635   :  { %1835 = vtanh.f32 %v480_v38  ;;  %v1513_v7 = vmul.f32 -1.442695, %v480_v38  ;;  %v1515_v54 = vmul.f32 -1.442695, %v558_v39 }
 0x636   :  { %1837 = vtanh.f32 %v558_v39  ;;  %v482_v48 = vpop.f32.mrf.mxu1  ;;  %v555_v49 = vpop.f32.mrf.mxu0 }
 0x637   :  { %1839 = vpow2.f32 %v1513_v7 }
 0x638   :  { %v1663_v50 = vpop.f32.mrf.mxu1  ;;  %v1671_v51 = vpop.f32.mrf.mxu0  ;;  %1841 = vpow2.f32 %v1515_v54 }
 0x642   :  { %v1836_v52 = vpop.eup %1835 }
 0x643   :  { %v1838_v53 = vpop.eup %1837  ;;  %494 = vrot.lane.b32.xlu0 %v1836_v52, %s1943_s15 }
 0x644   :  { %568 = vrot.lane.b32.xlu1 %v1838_v53, %s1943_s15  ;;  %v1840_v55 = vpop.eup %1839 }
 0x645   :  { %v1842_v56 = vpop.eup %1841  ;;  %v488_v57 = vadd.f32 1.0, %v1840_v55 }
 0x646   :  { %v562_v58 = vadd.f32 1.0, %v1842_v56 }
 0x647   :  { %1843 = vrcp.f32 %v488_v57 }
 0x648   :  { %1845 = vrcp.f32 %v562_v58 }
 0x654   :  { %v1844_v59 = vpop.eup %1843 }
 0x655   :  { %v1846_v61 = vpop.eup %1845  ;;  %v492_v3 = vmul.f32 %v1844_v59, %v2123_v18 }
 0x656   :  { %v566_v4 = vmul.f32 %v1846_v61, %v2121_v16 }
 0x6b5   :  { %v495_v60 = vpop.permute.xlu0 %494 }
 0x6b6   :  { %v569_v62 = vpop.permute.xlu1 %568  ;;  %v497_v63 = vmul.f32 %v1844_v59, %v495_v60 }
 0x6b7   :  { %v571_v1 = vmul.f32 %v1846_v61, %v569_v62 }
 0x6b8   :  { %499 = vrot.lane.b32.xlu0 %v497_v63, %s1943_s15 }
 0x6b9   :  { %573 = vrot.lane.b32.xlu1 %v571_v1, %s1943_s15 }
 0x72a   :  { %v500_v6 = vpop.permute.xlu0 %499 }
 0x72b   :  { %v574_v9 = vpop.permute.xlu1 %573  ;;  %v2160_v10 = vadd.f32 %v500_v6, %v492_v3 }
 0x72c   :  { %v2162_v11 = vadd.f32 %v574_v9, %v566_v4 }
 0x72d   :  { %1847 = vtanh.f32 %v2160_v10 }
 0x72e   :  { %1849 = vtanh.f32 %v2162_v11 }
 0x73a   :  { %v1848_v12 = vpop.eup %1847 }
 0x73b   :  { %v1850_v13 = vpop.eup %1849  ;;  %505 = vrot.lane.b32.xlu0 %v1848_v12, %s1943_s15 }
 0x73c   :  { %579 = vrot.lane.b32.xlu1 %v1850_v13, %s1943_s15 }
 0x7ad   :  { %v506_v14 = vpop.permute.xlu0 %505 }
 0x7ae   :  { %v580_v15 = vpop.permute.xlu1 %579  ;;  %v508_v17 = vmul.f32 %v1844_v59, %v506_v14 }
 0x7af   :  { %v582_v16 = vmul.f32 %v1846_v61, %v580_v15 }
 0x7b0   :  { %588 = vrot.lane.b32.xlu1 %v508_v17, %s1945_s5  ;;  %v137_v17 = vadd.f32 %v2031_v8, %v2103_v43 }
 0x7b1   :  { %584 = vrot.lane.b32.xlu0 %v582_v16, %s1944_s27  ;;  %v662_v18 = vpack.c.bf16 %v582_v16, %v582_v16 }
 0x7b5   :  { %664 = vrot.lane.b32.xlu0 %v662_v18, %s1944_s27 }
 0x822   :  { %v589_v19 = vpop.permute.xlu1 %588 }
 0x823   :  { %v585_v20 = vpop.permute.xlu0 %584 }
 0x824   :  { %v591_v21 = vsel %vm191_vm2, %v585_v20, %v589_v19 }
 0x825   :  { %v592_v22 = vpack.c.bf16 %v591_v21, %v591_v21 }
 0x827   :  { %1681 = vmatmul.mubr.msk.bf16.vlgmr.msra.gmra.mxu0 %vm290_vm3, %v592_v22  ;;  %v665_v23 = vpop.permute.xlu0 %664 }
 0x828   :  { %1689 = vmatmul.mubr.msk.bf16.vlgmr.msra.gmra.mxu1 %vm191_vm2, %v665_v23  ;;  %1705 = vmatpush3.bf16.msra.mxu0 %v2000_v2 }
 0x829   :  { %1693 = vmatpush3.bf16.msra.mxu1 %v2048_v28  ;;  %1706 = vmatprep.subr.bf16.mxu0 %v1940_v0 }
 0x82a   :  { %1694 = vmatprep.subr.bf16.mxu1 %v1940_v0  ;;  %1700 = vmatprep.mubr.msk.bf16.mxu1 %vm1941_vm0, %v1940_v0 }
 0x82b   :  { %1708 = vmatprep.mubr.msk.bf16.mxu0 %vm1941_vm0, %v1940_v0 }
 0x82c   :  { %1707 = vmatpush3.bf16.msra.mxu0 %v2014_v5 }
 0x82d   :  { %1695 = vmatpush3.bf16.msra.mxu1 %v2055_v29  ;;  %1712 = vmatprep.subr.bf16.mxu0 %v1940_v0 }
 0x82e   :  { %1696 = vmatprep.subr.bf16.mxu1 %v1940_v0 }
 0x831   :  { %1697 = vmatpush3.bf16.msra.mxu1 %v2065_v30 }
 0x832   :  { %1698 = vmatprep.subr.bf16.mxu1 %v1940_v0 }
 0x835   :  { %1699 = vmatpush3.bf16.msra.mxu1 %v2074_v32 }
 0x836   :  { %1724 = vmatprep.subr.bf16.mxu1 %v1940_v0 }
 0x8e7   :  { %v630_v25 = vpop.f32.mrf.mxu0 }
 0x8e8   :  { %v631_v26 = vadd.f32 %v2113_v47, %v630_v25  ;;  %v703_v27 = vpop.f32.mrf.mxu1 }
 0x8e9   :  { %v709_v31 = vadd.f32 %v703_v27, %v132_v24  ;;  %v1682_v33 = vpop.f32.mrf.mxu0 }
 0x8ea   :  { %1851 = vtanh.f32 %v631_v26  ;;  %v1690_v34 = vpop.f32.mrf.mxu1  ;;  %v1517_v40 = vmul.f32 -1.442695, %v631_v26 }
 0x8eb   :  { %1853 = vtanh.f32 %v709_v31  ;;  %v633_v35 = vpop.f32.mrf.mxu0  ;;  %v1519_v46 = vmul.f32 -1.442695, %v709_v31 }
 0x8ec   :  { %v706_v36 = vpop.f32.mrf.mxu1  ;;  %1855 = vpow2.f32 %v1517_v40 }
 0x8ed   :  { %v1683_v37 = vpop.f32.mrf.mxu0  ;;  %1857 = vpow2.f32 %v1519_v46 }
 0x8ee   :  { %v1691_v38 = vpop.f32.mrf.mxu1 }
 0x8f7   :  { %v1852_v39 = vpop.eup %1851 }
 0x8f8   :  { %v1854_v41 = vpop.eup %1853  ;;  %645 = vrot.lane.b32.xlu1 %v1852_v39, %s1943_s15 }
 0x8f9   :  { %719 = vrot.lane.b32.xlu0 %v1854_v41, %s1943_s15  ;;  %v1856_v48 = vpop.eup %1855 }
 0x8fa   :  { %v1858_v49 = vpop.eup %1857  ;;  %v639_v50 = vadd.f32 1.0, %v1856_v48 }
 0x8fb   :  { %v713_v51 = vadd.f32 1.0, %v1858_v49 }
 0x8fc   :  { %1859 = vrcp.f32 %v639_v50 }
 0x8fd   :  { %1861 = vrcp.f32 %v713_v51 }
 0x909   :  { %v1860_v52 = vpop.eup %1859 }
 0x90a   :  { %v1862_v7 = vpop.eup %1861  ;;  %v643_v57 = vmul.f32 %v1860_v52, %v2160_v10 }
 0x90b   :  { %v717_v59 = vmul.f32 %v1862_v7, %v2162_v11 }
 0x96a   :  { %v646_v53 = vpop.permute.xlu1 %645 }
 0x96b   :  { %v648_v54 = vmul.f32 %v1860_v52, %v646_v53  ;;  %v720_v55 = vpop.permute.xlu0 %719 }
 0x96c   :  { %v722_v56 = vmul.f32 %v1862_v7, %v720_v55 }
 0x96d   :  { %650 = vrot.lane.b32.xlu1 %v648_v54, %s1943_s15 }
 0x96e   :  { %724 = vrot.lane.b32.xlu0 %v722_v56, %s1943_s15 }
 0x9df   :  { %v651_v58 = vpop.permute.xlu1 %650 }
 0x9e0   :  { %v2199_v60 = vadd.f32 %v651_v58, %v643_v57  ;;  %v725_v61 = vpop.permute.xlu0 %724 }
 0x9e1   :  { %v2201_v62 = vadd.f32 %v725_v61, %v717_v59 }
 0x9e2   :  { %1863 = vtanh.f32 %v2199_v60 }
 0x9e3   :  { %1865 = vtanh.f32 %v2201_v62 }
 0x9ef   :  { %v1864_v63 = vpop.eup %1863 }
 0x9f0   :  { %v1866_v1 = vpop.eup %1865  ;;  %656 = vrot.lane.b32.xlu1 %v1864_v63, %s1943_s15 }
 0x9f1   :  { %730 = vrot.lane.b32.xlu0 %v1866_v1, %s1943_s15 }
 0xa62   :  { %v657_v3 = vpop.permute.xlu1 %656 }
 0xa63   :  { %v659_v4 = vmul.f32 %v1860_v52, %v657_v3  ;;  %v731_v6 = vpop.permute.xlu0 %730 }
 0xa64   :  { %v733_v9 = vmul.f32 %v1862_v7, %v731_v6 }
 0xa65   :  { %739 = vrot.lane.b32.xlu0 %v659_v4, %s1945_s5  ;;  %v140_v4 = vadd.f32 %v2031_v8, %v2107_v45 }
 0xa66   :  { %735 = vrot.lane.b32.xlu1 %v733_v9, %s1944_s27  ;;  %v813_v10 = vpack.c.bf16 %v733_v9, %v733_v9 }
 0xa6a   :  { %815 = vrot.lane.b32.xlu1 %v813_v10, %s1944_s27 }
 0xad7   :  { %v740_v11 = vpop.permute.xlu0 %739 }
 0xad8   :  { %v736_v12 = vpop.permute.xlu1 %735 }
 0xad9   :  { %v742_v13 = vsel %vm191_vm2, %v736_v12, %v740_v11 }
 0xada   :  { %v743_v14 = vpack.c.bf16 %v742_v13, %v742_v13 }
 0xadc   :  { %v816_v15 = vpop.permute.xlu1 %815  ;;  %1701 = vmatmul.mubr.msk.bf16.vlgmr.msra.gmra.mxu1 %vm290_vm3, %v743_v14 }
 0xadd   :  { %1709 = vmatmul.mubr.msk.bf16.vlgmr.msra.gmra.mxu0 %vm191_vm2, %v816_v15  ;;  %1725 = vmatpush3.bf16.msra.mxu1 %v2000_v2 }
 0xade   :  { %1713 = vmatpush3.bf16.msra.mxu0 %v2048_v28  ;;  %1726 = vmatprep.subr.bf16.mxu1 %v1940_v0 }
 0xadf   :  { %1714 = vmatprep.subr.bf16.mxu0 %v1940_v0  ;;  %1720 = vmatprep.mubr.msk.bf16.mxu0 %vm1941_vm0, %v1940_v0 }
 0xae0   :  { %1728 = vmatprep.mubr.msk.bf16.mxu1 %vm1941_vm0, %v1940_v0 }
 0xae1   :  { %1727 = vmatpush3.bf16.msra.mxu1 %v2014_v5 }
 0xae2   :  { %1715 = vmatpush3.bf16.msra.mxu0 %v2055_v29  ;;  %1732 = vmatprep.subr.bf16.mxu1 %v1940_v0 }
 0xae3   :  { %1716 = vmatprep.subr.bf16.mxu0 %v1940_v0 }
 0xae6   :  { %1717 = vmatpush3.bf16.msra.mxu0 %v2065_v30 }
 0xae7   :  { %1718 = vmatprep.subr.bf16.mxu0 %v1940_v0 }
 0xaea   :  { %1719 = vmatpush3.bf16.msra.mxu0 %v2074_v32 }
 0xaeb   :  { %1744 = vmatprep.subr.bf16.mxu0 %v1940_v0 }
 0xb9c   :  { %v781_v16 = vpop.f32.mrf.mxu1 }
 0xb9d   :  { %v782_v18 = vadd.f32 %v2113_v47, %v781_v16  ;;  %v854_v19 = vpop.f32.mrf.mxu0 }
 0xb9e   :  { %v860_v20 = vadd.f32 %v854_v19, %v137_v17  ;;  %v1702_v21 = vpop.f32.mrf.mxu1 }
 0xb9f   :  { %1867 = vtanh.f32 %v782_v18  ;;  %v1710_v22 = vpop.f32.mrf.mxu0  ;;  %v1521_v43 = vmul.f32 -1.442695, %v782_v18 }
 0xba0   :  { %1869 = vtanh.f32 %v860_v20  ;;  %v784_v23 = vpop.f32.mrf.mxu1  ;;  %v1523_v33 = vmul.f32 -1.442695, %v860_v20 }
 0xba1   :  { %v857_v24 = vpop.f32.mrf.mxu0  ;;  %1871 = vpow2.f32 %v1521_v43 }
 0xba2   :  { %v1703_v25 = vpop.f32.mrf.mxu1  ;;  %1873 = vpow2.f32 %v1523_v33 }
 0xba3   :  { %v1711_v26 = vpop.f32.mrf.mxu0 }
 0xbac   :  { %v1868_v27 = vpop.eup %1867 }
 0xbad   :  { %v1870_v31 = vpop.eup %1869  ;;  %796 = vrot.lane.b32.xlu0 %v1868_v27, %s1943_s15 }
 0xbae   :  { %870 = vrot.lane.b32.xlu1 %v1870_v31, %s1943_s15  ;;  %v1872_v34 = vpop.eup %1871 }
 0xbaf   :  { %v1874_v35 = vpop.eup %1873  ;;  %v790_v36 = vadd.f32 1.0, %v1872_v34 }
 0xbb0   :  { %v864_v37 = vadd.f32 1.0, %v1874_v35 }
 0xbb1   :  { %1875 = vrcp.f32 %v790_v36 }
 0xbb2   :  { %1877 = vrcp.f32 %v864_v37 }
 0xbbe   :  { %v1876_v38 = vpop.eup %1875 }
 0xbbf   :  { %v1878_v41 = vpop.eup %1877  ;;  %v794_v49 = vmul.f32 %v1876_v38, %v2199_v60 }
 0xbc0   :  { %v868_v51 = vmul.f32 %v1878_v41, %v2201_v62 }
 0xc1f   :  { %v797_v39 = vpop.permute.xlu0 %796 }
 0xc20   :  { %v799_v40 = vmul.f32 %v1876_v38, %v797_v39  ;;  %v871_v46 = vpop.permute.xlu1 %870 }
 0xc21   :  { %v873_v48 = vmul.f32 %v1878_v41, %v871_v46 }
 0xc22   :  { %801 = vrot.lane.b32.xlu0 %v799_v40, %s1943_s15 }
 0xc23   :  { %875 = vrot.lane.b32.xlu1 %v873_v48, %s1943_s15 }
 0xc94   :  { %v802_v50 = vpop.permute.xlu0 %801 }
 0xc95   :  { %v2238_v52 = vadd.f32 %v802_v50, %v794_v49  ;;  %v876_v53 = vpop.permute.xlu1 %875 }
 0xc96   :  { %v2240_v7 = vadd.f32 %v876_v53, %v868_v51 }
 0xc97   :  { %1879 = vtanh.f32 %v2238_v52 }
 0xc98   :  { %1881 = vtanh.f32 %v2240_v7 }
 0xca4   :  { %v1880_v54 = vpop.eup %1879 }
 0xca5   :  { %v1882_v55 = vpop.eup %1881  ;;  %807 = vrot.lane.b32.xlu0 %v1880_v54, %s1943_s15 }
 0xca6   :  { %881 = vrot.lane.b32.xlu1 %v1882_v55, %s1943_s15 }
 0xd17   :  { %v808_v56 = vpop.permute.xlu0 %807 }
 0xd18   :  { %v810_v57 = vmul.f32 %v1876_v38, %v808_v56  ;;  %v882_v58 = vpop.permute.xlu1 %881 }
 0xd19   :  { %v884_v59 = vmul.f32 %v1878_v41, %v882_v58 }
 0xd1a   :  { %890 = vrot.lane.b32.xlu1 %v810_v57, %s1945_s5 }
 0xd1b   :  { %886 = vrot.lane.b32.xlu0 %v884_v59, %s1944_s27  ;;  %v964_v60 = vpack.c.bf16 %v884_v59, %v884_v59 }
 0xd1f   :  { %966 = vrot.lane.b32.xlu0 %v964_v60, %s1944_s27 }
 0xd8c   :  { %v891_v61 = vpop.permute.xlu1 %890 }
 0xd8d   :  { %v887_v62 = vpop.permute.xlu0 %886 }
 0xd8e   :  { %v893_v63 = vsel %vm191_vm2, %v887_v62, %v891_v61 }
 0xd8f   :  { %v894_v1 = vpack.c.bf16 %v893_v63, %v893_v63 }
 0xd91   :  { %1721 = vmatmul.mubr.msk.bf16.vlgmr.msra.gmra.mxu0 %vm290_vm3, %v894_v1  ;;  %v967_v3 = vpop.permute.xlu0 %966 }
 0xd92   :  { %1729 = vmatmul.mubr.msk.bf16.vlgmr.msra.gmra.mxu1 %vm191_vm2, %v967_v3  ;;  %1745 = vmatpush3.bf16.msra.mxu0 %v2000_v2 }
 0xd93   :  { %1733 = vmatpush3.bf16.msra.mxu1 %v2048_v28  ;;  %1746 = vmatprep.subr.bf16.mxu0 %v1940_v0 }
 0xd94   :  { %1734 = vmatprep.subr.bf16.mxu1 %v1940_v0  ;;  %1740 = vmatprep.mubr.msk.bf16.mxu1 %vm1941_vm0, %v1940_v0 }
 0xd95   :  { %1748 = vmatprep.mubr.msk.bf16.mxu0 %vm1941_vm0, %v1940_v0 }
 0xd96   :  { %1747 = vmatpush3.bf16.msra.mxu0 %v2014_v5 }
 0xd97   :  { %1735 = vmatpush3.bf16.msra.mxu1 %v2055_v29  ;;  %1752 = vmatprep.subr.bf16.mxu0 %v1940_v0 }
 0xd98   :  { %1736 = vmatprep.subr.bf16.mxu1 %v1940_v0 }
 0xd9b   :  { %1737 = vmatpush3.bf16.msra.mxu1 %v2065_v30 }
 0xd9c   :  { %1738 = vmatprep.subr.bf16.mxu1 %v1940_v0 }
 0xd9f   :  { %1739 = vmatpush3.bf16.msra.mxu1 %v2074_v32 }
 0xda0   :  { %1764 = vmatprep.subr.bf16.mxu1 %v1940_v0 }
 0xe51   :  { %v932_v6 = vpop.f32.mrf.mxu0 }
 0xe52   :  { %v933_v9 = vadd.f32 %v2113_v47, %v932_v6  ;;  %v1005_v10 = vpop.f32.mrf.mxu1 }
 0xe53   :  { %v1011_v11 = vadd.f32 %v1005_v10, %v140_v4  ;;  %v1722_v12 = vpop.f32.mrf.mxu0 }
 0xe54   :  { %1883 = vtanh.f32 %v933_v9  ;;  %v1730_v13 = vpop.f32.mrf.mxu1  ;;  %v1525_v45 = vmul.f32 -1.442695, %v933_v9 }
 0xe55   :  { %1885 = vtanh.f32 %v1011_v11  ;;  %v935_v14 = vpop.f32.mrf.mxu0  ;;  %v1527_v20 = vmul.f32 -1.442695, %v1011_v11 }
 0xe56   :  { %v1008_v15 = vpop.f32.mrf.mxu1  ;;  %1887 = vpow2.f32 %v1525_v45 }
 0xe57   :  { %v1723_v17 = vpop.f32.mrf.mxu0  ;;  %1889 = vpow2.f32 %v1527_v20 }
 0xe58   :  { %v1731_v16 = vpop.f32.mrf.mxu1 }
 0xe61   :  { %v1884_v18 = vpop.eup %1883 }
 0xe62   :  { %v1886_v19 = vpop.eup %1885  ;;  %947 = vrot.lane.b32.xlu1 %v1884_v18, %s1943_s15 }
 0xe63   :  { %1021 = vrot.lane.b32.xlu0 %v1886_v19, %s1943_s15  ;;  %v1888_v21 = vpop.eup %1887 }
 0xe64   :  { %v1890_v22 = vpop.eup %1889  ;;  %v941_v23 = vadd.f32 1.0, %v1888_v21 }
 0xe65   :  { %v1015_v24 = vadd.f32 1.0, %v1890_v22 }
 0xe66   :  { %1891 = vrcp.f32 %v941_v23 }
 0xe67   :  { %1893 = vrcp.f32 %v1015_v24 }
 0xe73   :  { %v1892_v25 = vpop.eup %1891 }
 0xe74   :  { %v1894_v27 = vpop.eup %1893  ;;  %v945_v34 = vmul.f32 %v1892_v25, %v2238_v52 }
 0xe75   :  { %v1019_v36 = vmul.f32 %v1894_v27, %v2240_v7 }
 0xed4   :  { %v948_v26 = vpop.permute.xlu1 %947 }
 0xed5   :  { %v950_v31 = vmul.f32 %v1892_v25, %v948_v26  ;;  %v1022_v43 = vpop.permute.xlu0 %1021 }
 0xed6   :  { %v1024_v33 = vmul.f32 %v1894_v27, %v1022_v43 }
 0xed7   :  { %952 = vrot.lane.b32.xlu1 %v950_v31, %s1943_s15 }
 0xed8   :  { %1026 = vrot.lane.b32.xlu0 %v1024_v33, %s1943_s15 }
 0xf49   :  { %v953_v35 = vpop.permute.xlu1 %952 }
 0xf4a   :  { %v2277_v37 = vadd.f32 %v953_v35, %v945_v34  ;;  %v1027_v38 = vpop.permute.xlu0 %1026 }
 0xf4b   :  { %v2279_v39 = vadd.f32 %v1027_v38, %v1019_v36  ;;  %v1939_v38 = vld [vmem:[%s2380_s3] ss:$0 sm:$0xff] }
 0xf4c   :  { %1895 = vtanh.f32 %v2277_v37 }
 0xf4d   :  { %1897 = vtanh.f32 %v2279_v39 }
 0xf59   :  { %v1896_v41 = vpop.eup %1895 }
 0xf5a   :  { %v1898_v40 = vpop.eup %1897  ;;  %958 = vrot.lane.b32.xlu1 %v1896_v41, %s1943_s15 }
 0xf5b   :  { %1032 = vrot.lane.b32.xlu0 %v1898_v40, %s1943_s15 }
 0xfcc   :  { %v959_v46 = vpop.permute.xlu1 %958 }
 0xfcd   :  { %v961_v48 = vmul.f32 %v1892_v25, %v959_v46  ;;  %v1033_v49 = vpop.permute.xlu0 %1032 }
 0xfce   :  { %v1035_v50 = vmul.f32 %v1894_v27, %v1033_v49 }
 0xfcf   :  { %1041 = vrot.lane.b32.xlu0 %v961_v48, %s1945_s5 }
 0xfd0   :  { %1037 = vrot.lane.b32.xlu1 %v1035_v50, %s1944_s27  ;;  %v1115_v51 = vpack.c.bf16 %v1035_v50, %v1035_v50 }
 0xfd4   :  { %1117 = vrot.lane.b32.xlu1 %v1115_v51, %s1944_s27 }
0x1041   :  { %v1042_v52 = vpop.permute.xlu0 %1041 }
0x1042   :  { %v1038_v53 = vpop.permute.xlu1 %1037 }
0x1043   :  { %v1044_v7 = vsel %vm191_vm2, %v1038_v53, %v1042_v52 }
0x1044   :  { %v1045_v54 = vpack.c.bf16 %v1044_v7, %v1044_v7 }
0x1046   :  { %v1118_v55 = vpop.permute.xlu1 %1117  ;;  %1741 = vmatmul.mubr.msk.bf16.vlgmr.msra.gmra.mxu1 %vm290_vm3, %v1045_v54 }
0x1047   :  { %1749 = vmatmul.mubr.msk.bf16.vlgmr.msra.gmra.mxu0 %vm191_vm2, %v1118_v55  ;;  %1765 = vmatpush3.bf16.msra.mxu1 %v2000_v2  ;;  %v145_v2 = vadd.f32 %v2101_v42, %v2031_v8 }
0x1048   :  { %1753 = vmatpush3.bf16.msra.mxu0 %v2048_v28  ;;  %1766 = vmatprep.subr.bf16.mxu1 %v1940_v0 }
0x1049   :  { %1754 = vmatprep.subr.bf16.mxu0 %v1940_v0  ;;  %1760 = vmatprep.mubr.msk.bf16.mxu0 %vm1941_vm0, %v1940_v0 }
0x104a   :  { %1768 = vmatprep.mubr.msk.bf16.mxu1 %vm1941_vm0, %v1940_v0 }
0x104b   :  { %1767 = vmatpush3.bf16.msra.mxu1 %v2014_v5 }
0x104c   :  { %1755 = vmatpush3.bf16.msra.mxu0 %v2055_v29  ;;  %1772 = vmatprep.subr.bf16.mxu1 %v1940_v0 }
0x104d   :  { %1756 = vmatprep.subr.bf16.mxu0 %v1940_v0 }
0x1050   :  { %1757 = vmatpush3.bf16.msra.mxu0 %v2065_v30 }
0x1051   :  { %1758 = vmatprep.subr.bf16.mxu0 %v1940_v0 }
0x1054   :  { %1759 = vmatpush3.bf16.msra.mxu0 %v2074_v32 }
0x1055   :  { %1784 = vmatprep.subr.bf16.mxu0 %v1940_v0 }
0x1106   :  { %v1083_v56 = vpop.f32.mrf.mxu1 }
0x1107   :  { %v1084_v5 = vadd.f32 %v2113_v47, %v1083_v56  ;;  %v1156_v57 = vpop.f32.mrf.mxu0 }
0x1108   :  { %v1162_v58 = vadd.f32 %v1156_v57, %v145_v2  ;;  %v1742_v59 = vpop.f32.mrf.mxu1 }
0x1109   :  { %1899 = vtanh.f32 %v1084_v5  ;;  %v1750_v60 = vpop.f32.mrf.mxu0  ;;  %v1529_v8 = vmul.f32 -1.442695, %v1084_v5 }
0x110a   :  { %1901 = vtanh.f32 %v1162_v58  ;;  %v1086_v61 = vpop.f32.mrf.mxu1  ;;  %v1531_v42 = vmul.f32 -1.442695, %v1162_v58 }
0x110b   :  { %v1159_v62 = vpop.f32.mrf.mxu0  ;;  %1903 = vpow2.f32 %v1529_v8 }
0x110c   :  { %v1743_v63 = vpop.f32.mrf.mxu1  ;;  %1905 = vpow2.f32 %v1531_v42 }
0x110d   :  { %v1751_v1 = vpop.f32.mrf.mxu0 }
0x1116   :  { %v1900_v3 = vpop.eup %1899 }
0x1117   :  { %v1902_v4 = vpop.eup %1901  ;;  %1098 = vrot.lane.b32.xlu0 %v1900_v3, %s1943_s15 }
0x1118   :  { %1172 = vrot.lane.b32.xlu1 %v1902_v4, %s1943_s15  ;;  %v1904_v6 = vpop.eup %1903 }
0x1119   :  { %v1906_v9 = vpop.eup %1905  ;;  %v1092_v10 = vadd.f32 1.0, %v1904_v6 }
0x111a   :  { %v1166_v11 = vadd.f32 1.0, %v1906_v9 }
0x111b   :  { %1907 = vrcp.f32 %v1092_v10 }
0x111c   :  { %1909 = vrcp.f32 %v1166_v11 }
0x1128   :  { %v1908_v12 = vpop.eup %1907 }
0x1129   :  { %v1910_v14 = vpop.eup %1909  ;;  %v1096_v18 = vmul.f32 %v1908_v12, %v2277_v37 }
0x112a   :  { %v1170_v45 = vmul.f32 %v1910_v14, %v2279_v39 }
0x1189   :  { %v1099_v13 = vpop.permute.xlu0 %1098 }
0x118a   :  { %v1101_v15 = vmul.f32 %v1908_v12, %v1099_v13  ;;  %v1173_v17 = vpop.permute.xlu1 %1172 }
0x118b   :  { %v1175_v16 = vmul.f32 %v1910_v14, %v1173_v17 }
0x118c   :  { %1103 = vrot.lane.b32.xlu0 %v1101_v15, %s1943_s15 }
0x118d   :  { %1177 = vrot.lane.b32.xlu1 %v1175_v16, %s1943_s15 }
0x11fe   :  { %v1104_v19 = vpop.permute.xlu0 %1103 }
0x11ff   :  { %v2316_v20 = vadd.f32 %v1104_v19, %v1096_v18  ;;  %v1178_v21 = vpop.permute.xlu1 %1177 }
0x1200   :  { %v2318_v22 = vadd.f32 %v1178_v21, %v1170_v45 }
0x1201   :  { %1911 = vtanh.f32 %v2316_v20 }
0x1202   :  { %1913 = vtanh.f32 %v2318_v22 }
0x120e   :  { %v1912_v23 = vpop.eup %1911 }
0x120f   :  { %v1914_v24 = vpop.eup %1913  ;;  %1109 = vrot.lane.b32.xlu0 %v1912_v23, %s1943_s15 }
0x1210   :  { %1183 = vrot.lane.b32.xlu1 %v1914_v24, %s1943_s15 }
0x1281   :  { %v1110_v25 = vpop.permute.xlu0 %1109 }
0x1282   :  { %v1112_v26 = vmul.f32 %v1908_v12, %v1110_v25  ;;  %v1184_v27 = vpop.permute.xlu1 %1183 }
0x1283   :  { %v1186_v31 = vmul.f32 %v1910_v14, %v1184_v27 }
0x1284   :  { %1192 = vrot.lane.b32.xlu1 %v1112_v26, %s1945_s5 }
0x1285   :  { %1188 = vrot.lane.b32.xlu0 %v1186_v31, %s1944_s27  ;;  %v1266_v43 = vpack.c.bf16 %v1186_v31, %v1186_v31 }
0x1289   :  { %1268 = vrot.lane.b32.xlu0 %v1266_v43, %s1944_s27  ;;  %v1809_v43 = vld [vmem:[%s2383_s6 + $0x8] sm:$0xff]  }
0x12f6   :  { %v1193_v33 = vpop.permute.xlu1 %1192 }
0x12f7   :  { %v1189_v34 = vpop.permute.xlu0 %1188 }
0x12f8   :  { %v1195_v35 = vsel %vm191_vm2, %v1189_v34, %v1193_v33  ;;  %v1810_v33 = vld [vmem:[%s2383_s6] sm:$0xff]  }
0x12f9   :  { %v1196_v36 = vpack.c.bf16 %v1195_v35, %v1195_v35 }
0x12fb   :  { %1761 = vmatmul.mubr.msk.bf16.vlgmr.msra.gmra.mxu0 %vm290_vm3, %v1196_v36  ;;  %v1269_v37 = vpop.permute.xlu0 %1268 }
0x12fc   :  { %1769 = vmatmul.mubr.msk.bf16.vlgmr.msra.gmra.mxu1 %vm191_vm2, %v1269_v37  ;;  %1788 = vmatprep.mubr.msk.bf16.mxu0 %vm1941_vm0, %v1940_v0 }
0x12fd   :  { %1773 = vmatpush3.bf16.msra.mxu1 %v2048_v28  ;;  %1780 = vmatprep.mubr.msk.bf16.mxu1 %vm1941_vm0, %v1940_v0  ;;  %v148_v28 = vadd.f32 %v1939_v38, %v2105_v44 }
0x12fe   :  { %1774 = vmatprep.subr.bf16.mxu1 %v1940_v0  ;;  %1785 = vmatpush3.bf16.msra.mxu0 %v1809_v43 }
0x12ff   :  { %1786 = vmatprep.subr.bf16.mxu0 %v1940_v0 }
0x1301   :  { %1775 = vmatpush3.bf16.msra.mxu1 %v2055_v29 }
0x1302   :  { %1776 = vmatprep.subr.bf16.mxu1 %v1940_v0  ;;  %1787 = vmatpush3.bf16.msra.mxu0 %v1810_v33 }
0x1305   :  { %1777 = vmatpush3.bf16.msra.mxu1 %v2065_v30 }
0x1306   :  { %1778 = vmatprep.subr.bf16.mxu1 %v1940_v0 }
0x1309   :  { %1779 = vmatpush3.bf16.msra.mxu1 %v2074_v32 }
0x13bb   :  { %v1234_v39 = vpop.f32.mrf.mxu0 }
0x13bc   :  { %v1235_v41 = vadd.f32 %v2113_v47, %v1234_v39  ;;  %v1307_v40 = vpop.f32.mrf.mxu1 }
0x13bd   :  { %v1313_v46 = vadd.f32 %v1307_v40, %v148_v28  ;;  %v1762_v29 = vpop.f32.mrf.mxu0  ;;  %v1538_v28 = vld [vmem:[%s2384_s7] ss:$0 sm:$0xff] }
0x13be   :  { %1915 = vtanh.f32 %v1235_v41  ;;  %v1770_v48 = vpop.f32.mrf.mxu1  ;;  %v1533_v44 = vmul.f32 -1.442695, %v1235_v41 }
0x13bf   :  { %1917 = vtanh.f32 %v1313_v46  ;;  %v1237_v30 = vpop.f32.mrf.mxu0  ;;  %v1535_v53 = vmul.f32 -1.442695, %v1313_v46 }
0x13c0   :  { %v1310_v49 = vpop.f32.mrf.mxu1  ;;  %1919 = vpow2.f32 %v1533_v44 }
0x13c1   :  { %v1763_v50 = vpop.f32.mrf.mxu0  ;;  %1921 = vpow2.f32 %v1535_v53 }
0x13c2   :  { %v1771_v51 = vpop.f32.mrf.mxu1 }
0x13cb   :  { %v1916_v32 = vpop.eup %1915 }
0x13cc   :  { %v1918_v52 = vpop.eup %1917  ;;  %1249 = vrot.lane.b32.xlu1 %v1916_v32, %s1943_s15 }
0x13cd   :  { %1323 = vrot.lane.b32.xlu0 %v1918_v52, %s1943_s15  ;;  %v1920_v7 = vpop.eup %1919 }
0x13ce   :  { %v1922_v54 = vpop.eup %1921  ;;  %v1243_v55 = vadd.f32 1.0, %v1920_v7 }
0x13cf   :  { %v1317_v2 = vadd.f32 1.0, %v1922_v54 }
0x13d0   :  { %1923 = vrcp.f32 %v1243_v55 }
0x13d1   :  { %1925 = vrcp.f32 %v1317_v2 }
0x13dd   :  { %v1924_v56 = vpop.eup %1923 }
0x13de   :  { %v1926_v57 = vpop.eup %1925  ;;  %v1247_v61 = vmul.f32 %v1924_v56, %v2316_v20 }
0x13df   :  { %v1321_v63 = vmul.f32 %v1926_v57, %v2318_v22 }
0x143e   :  { %v1250_v5 = vpop.permute.xlu1 %1249 }
0x143f   :  { %v1252_v58 = vmul.f32 %v1924_v56, %v1250_v5  ;;  %v1324_v59 = vpop.permute.xlu0 %1323 }
0x1440   :  { %v1326_v60 = vmul.f32 %v1926_v57, %v1324_v59 }
0x1441   :  { %1254 = vrot.lane.b32.xlu1 %v1252_v58, %s1943_s15 }
0x1442   :  { %1328 = vrot.lane.b32.xlu0 %v1326_v60, %s1943_s15 }
0x14b3   :  { %v1255_v62 = vpop.permute.xlu1 %1254 }
0x14b4   :  { %v1257_v1 = vadd.f32 %v1255_v62, %v1247_v61  ;;  %v1329_v3 = vpop.permute.xlu0 %1328 }
0x14b5   :  { %v1331_v4 = vadd.f32 %v1329_v3, %v1321_v63 }
0x14b6   :  { %1927 = vtanh.f32 %v1257_v1 }
0x14b7   :  { %1929 = vtanh.f32 %v1331_v4 }
0x14c3   :  { %v1928_v8 = vpop.eup %1927 }
0x14c4   :  { %v1930_v42 = vpop.eup %1929  ;;  %1260 = vrot.lane.b32.xlu1 %v1928_v8, %s1943_s15 }
0x14c5   :  { %1334 = vrot.lane.b32.xlu0 %v1930_v42, %s1943_s15 }
0x1536   :  { %v1261_v6 = vpop.permute.xlu1 %1260 }
0x1537   :  { %v1263_v9 = vmul.f32 %v1924_v56, %v1261_v6  ;;  %v1335_v10 = vpop.permute.xlu0 %1334 }
0x1538   :  { %v1337_v11 = vmul.f32 %v1926_v57, %v1335_v10 }
0x1539   :  { %1343 = vrot.lane.b32.xlu0 %v1263_v9, %s1945_s5 }
0x153a   :  { %1339 = vrot.lane.b32.xlu1 %v1337_v11, %s1944_s27 }
0x15ab   :  { %v1344_v12 = vpop.permute.xlu0 %1343 }
0x15ac   :  { %v1340_v13 = vpop.permute.xlu1 %1339 }
0x15ad   :  { %v1346_v14 = vsel %vm191_vm2, %v1340_v13, %v1344_v12 }
0x15ae   :  { %v1347_v15 = vpack.c.bf16 %v1346_v14, %v1346_v14 }
0x15b0   :  { %1781 = vmatmul.mubr.msk.bf16.vlgmr.msra.gmra.mxu1 %vm290_vm3, %v1347_v15 }
0x1670   :  { %v1385_v17 = vpop.f32.mrf.mxu1 }
0x1671   :  { %v1386_v16 = vadd.f32 %v2113_v47, %v1385_v17 }
0x1672   :  { %v1782_v18 = vpop.f32.mrf.mxu1 }
0x1673   :  { %1931 = vtanh.f32 %v1386_v16  ;;  %v1537_v21 = vmul.f32 -1.442695, %v1386_v16 }
0x1674   :  { %v1388_v19 = vpop.f32.mrf.mxu1 }
0x1675   :  { %1933 = vpow2.f32 %v1537_v21 }
0x1676   :  { %v1783_v45 = vpop.f32.mrf.mxu1 }
0x1680   :  { %v1932_v20 = vpop.eup %1931 }
0x1681   :  { %1400 = vrot.lane.b32.xlu1 %v1932_v20, %s1943_s15 }
0x1682   :  { %v1934_v22 = vpop.eup %1933 }
0x1683   :  { %v1394_v23 = vadd.f32 1.0, %v1934_v22 }
0x1685   :  { %1935 = vrcp.f32 %v1394_v23 }
0x1692   :  { %v1936_v24 = vpop.eup %1935 }
0x1693   :  { %v1398_v27 = vmul.f32 %v1936_v24, %v1257_v1 }
0x16f3   :  { %v1401_v25 = vpop.permute.xlu1 %1400 }
0x16f4   :  { %v1403_v26 = vmul.f32 %v1936_v24, %v1401_v25 }
0x16f6   :  { %1405 = vrot.lane.b32.xlu0 %v1403_v26, %s1943_s15 }
0x1768   :  { %v1406_v31 = vpop.permute.xlu0 %1405 }
0x1769   :  { %v1408_v47 = vadd.f32 %v1406_v31, %v1398_v27 }
0x176b   :  { %1937 = vtanh.f32 %v1408_v47 }
0x1778   :  { %v1938_v34 = vpop.eup %1937 }
0x1779   :  { %1411 = vrot.lane.b32.xlu1 %v1938_v34, %s1943_s15 }
0x17eb   :  { %v1412_v35 = vpop.permute.xlu1 %1411 }
0x17ec   :  { %v1414_v36 = vmul.f32 %v1936_v24, %v1412_v35 }
0x17ee   :  { %v1415_v37 = vpack.c.bf16 %v1414_v36, %v1414_v36 }
0x17f0   :  { %1428 = vrot.lane.b32.xlu0 %v1415_v37, %s1944_s27 }
0x1862   :  { %v1429_v38 = vpop.permute.xlu0 %1428 }
0x1863   :  { %1789 = vmatmul.mubr.msk.bf16.vlgmr.msra.gmra.mxu0 %vm191_vm2, %v1429_v38 }
0x1923   :  { %v1479_v39 = vpop.f32.mrf.mxu0 }
0x1924   :  { %v1480_v41 = vadd.f32 %v1538_v28, %v1479_v39 }
0x1925   :  { %v1790_v40 = vpop.f32.mrf.mxu0 }
0x1926   :  { %1485 = vst [vmem:[%s2385_s8] sm:$0xff] %v1480_v41 }
0x1927   :  { %v1482_v0 = vpop.f32.mrf.mxu0 }
0x1929   :  { %v1791_v46 = vpop.f32.mrf.mxu0 }

</bundles_post_ra>
